<compile_context>
chip_gen: v7x
topology: tpu7x:2x2x1
jax: 0.10.0
libtpu: 0.0.40
codegen_flags: <defaults>
</compile_context>

<pallas_src>
import functools
import math

import jax
import jax.numpy as jnp
from jax import lax
from jax.experimental import pallas as pl
from jax.experimental.pallas import tpu as pltpu


def _round_up(a, m):
    return ((a + m - 1) // m) * m


def _encode_basic_kernel(body_ref, halo_ref, wdw_ref, bdw_ref, wpw_ref, bpw_ref,
                         out_ref, xbuf_ref, *, tile_h, wo, stride, dilation):
    """One (batch, row-tile) step.

    body_ref: (tile_h*stride, Wp, Cin)   non-overlapping input rows
    halo_ref: (2*dilation,   Wp, Cin)    bottom halo rows (top rows of next tile)
    wdw_ref:  (3, 3, Cin)                depthwise weights, BN scale pre-folded
    bdw_ref:  (1, Cin)                   depthwise BN bias
    wpw_ref:  (Cin, Cout_pad)            pointwise weights, BN scale pre-folded
    bpw_ref:  (1, Cout_pad)              pointwise BN bias
    out_ref:  (tile_h, wo, Cout_pad)
    xbuf_ref: (tile_h*stride + 2*dilation, Wp, Cin)  VMEM scratch (assembled window)
    """
    body_rows = body_ref.shape[0]
    halo_rows = halo_ref.shape[0]
    hin = body_rows + halo_rows
    cin = body_ref.shape[-1]

    # Assemble the input row window (body rows + bottom halo rows) in VMEM scratch.
    xbuf_ref[0:body_rows] = body_ref[...]
    xbuf_ref[body_rows:hin] = halo_ref[...]
    x = xbuf_ref[...].astype(jnp.float32)          # (hin, Wp, Cin)

    wdw = wdw_ref[...].astype(jnp.float32)         # (3, 3, Cin)

    # ---- depthwise 3x3: shift along W (sublanes) only 3x, then cheap H slices ----
    xw = []
    for kw in range(3):
        w0 = kw * dilation
        if stride == 1:
            xw.append(x[:, w0:w0 + wo, :])
        else:
            xw.append(lax.slice(x, (0, w0, 0),
                                (hin, w0 + (wo - 1) * stride + 1, cin),
                                (1, stride, 1)))

    acc = jnp.zeros((tile_h, wo, cin), jnp.float32)
    for kh in range(3):
        h0 = kh * dilation
        for kw in range(3):
            if stride == 1:
                tap = xw[kw][h0:h0 + tile_h]
            else:
                tap = lax.slice(xw[kw], (h0, 0, 0),
                                (h0 + (tile_h - 1) * stride + 1, wo, cin),
                                (stride, 1, 1))
            acc = acc + tap * wdw[kh, kw]

    # depthwise BN bias + ReLU (scale already folded into wdw)
    dw = jnp.maximum(acc + bdw_ref[0].astype(jnp.float32), 0.0)

    # ---- pointwise 1x1 as one MXU matmul: M = tile_h*wo (wo % 8 == 0, no relayout) --
    wpw = wpw_ref[...]
    dw2 = dw.reshape(tile_h * wo, cin).astype(wpw.dtype)
    pw = jnp.dot(dw2, wpw, preferred_element_type=jnp.float32)
    pw = jnp.maximum(pw + bpw_ref[0].astype(jnp.float32), 0.0)
    out_ref[...] = pw.reshape(tile_h, wo, pw.shape[-1]).astype(out_ref.dtype)


def _fold_bn(gamma, beta, mean, var, eps):
    inv = gamma / jnp.sqrt(var + eps)
    return inv, beta - mean * inv


def _choose_tile_h(Ho, Wo_k, Wp_k, Cin, Cout_pad, stride, dilation,
                   in_bytes, out_bytes, budget=10 * 1024 * 1024):
    """Largest output-row tile whose estimated VMEM footprint fits a conservative
    budget (fits v5e's 16 MiB default scoped VMEM and v7x's 64 MiB physical)."""
    unit = (2 * dilation) // math.gcd(stride, 2 * dilation)  # tile*stride % (2*dil) == 0

    def vmem_est(th):
        body = th * stride * Wp_k * Cin * in_bytes * 2            # double-buffered
        halo = 2 * dilation * Wp_k * Cin * in_bytes * 2
        outb = th * Wo_k * Cout_pad * out_bytes * 2
        interm = ((th * stride + 2 * dilation) * Wp_k * Cin       # xbuf + f32 copy
                  + 4 * th * Wo_k * Cin                           # 3 W-shifts + acc
                  + 2 * th * Wo_k * Cout_pad) * 4                 # matmul out + relu
        return body + halo + outb + interm

    tile = min(_round_up(Ho, unit), _round_up(128, unit))
    while tile > unit and vmem_est(tile) > budget:
        tile -= unit
    return max(tile, unit)


def encode_basic_layer(x_nchw, w_dw, bn_dw, w_pw, bn_pw, *,
                       stride=1, dilation=1, eps=1e-5, tile_h=None):
    """x_nchw: (N, Cin, H, W); w_dw: (Cin, 1, 3, 3) OIHW; w_pw: (Cout, Cin, 1, 1) OIHW.
    bn_*: (gamma, beta, running_mean, running_var) — inference-mode BatchNorm."""
    N, Cin, H, W = x_nchw.shape
    Cout = w_pw.shape[0]
    pad = dilation
    Ho = (H + 2 * pad - 2 * dilation - 1) // stride + 1
    Wo = (W + 2 * pad - 2 * dilation - 1) // stride + 1

    Cout_pad = _round_up(Cout, 128)          # lane-dense output stores
    Wo_k = _round_up(Wo, 8)                  # sublane-aligned matmul M / stores
    Wp_k = max(W + 2 * pad, (Wo_k - 1) * stride + 2 * dilation + 1)
    Hp = H + 2 * pad

    # ---- glue (plain JAX): layout, BN folding into weights, spatial padding ----
    x = jnp.transpose(x_nchw, (0, 2, 3, 1))                       # NHWC
    s_dw, o_dw = _fold_bn(*bn_dw, eps)
    s_pw, o_pw = _fold_bn(*bn_pw, eps)

    wdw = jnp.transpose(w_dw[:, 0], (1, 2, 0)).astype(jnp.float32) * s_dw     # (3,3,Cin)
    wpw = (jnp.transpose(w_pw[:, :, 0, 0], (1, 0)).astype(jnp.float32)
           * s_pw[None, :])                                                    # (Cin,Cout)
    wpw = jnp.pad(wpw, ((0, 0), (0, Cout_pad - Cout))).astype(x.dtype)
    b_dw = o_dw.reshape(1, Cin).astype(jnp.float32)
    b_pw = jnp.pad(o_pw, (0, Cout_pad - Cout)).reshape(1, Cout_pad).astype(jnp.float32)

    in_bytes = x.dtype.itemsize
    out_bytes = x.dtype.itemsize
    if tile_h is None:
        tile_h = _choose_tile_h(Ho, Wo_k, Wp_k, Cin, Cout_pad, stride, dilation,
                                in_bytes, out_bytes)
    else:
        unit = (2 * dilation) // math.gcd(stride, 2 * dilation)
        tile_h = _round_up(tile_h, unit)

    n_tiles = -(-Ho // tile_h)
    body_rows = tile_h * stride
    halo_rows = 2 * dilation
    halo_step = body_rows // halo_rows          # exact by construction of tile_h
    h_total = n_tiles * body_rows + halo_rows   # >= Hp, multiple of halo_rows

    x_pad = jnp.pad(x, ((0, 0),
                        (pad, pad + (h_total - Hp)),
                        (pad, Wp_k - W - pad),
                        (0, 0)))

    kernel = functools.partial(_encode_basic_kernel, tile_h=tile_h, wo=Wo_k,
                               stride=stride, dilation=dilation)

    flops = int(N * n_tiles * tile_h * Wo_k * Cin * (2 * 9 + 2 * Cout_pad))
    bytes_accessed = int(x_pad.size * x_pad.dtype.itemsize
                         + N * n_tiles * tile_h * Wo_k * Cout_pad * out_bytes
                         + wpw.size * wpw.dtype.itemsize + wdw.size * 4)

    out_nhwc = pl.pallas_call(
        kernel,
        out_shape=jax.ShapeDtypeStruct((N, n_tiles * tile_h, Wo_k, Cout_pad), x.dtype),
        grid_spec=pltpu.PrefetchScalarGridSpec(
            num_scalar_prefetch=0,
            grid=(N, n_tiles),
            in_specs=[
                # non-overlapping body rows of the current tile
                pl.BlockSpec((None, body_rows, Wp_k, Cin), lambda n, t: (n, t, 0, 0)),
                # bottom halo rows = first rows of the next body tile
                pl.BlockSpec((None, halo_rows, Wp_k, Cin),
                             lambda n, t: (n, (t + 1) * halo_step, 0, 0)),
                pl.BlockSpec((3, 3, Cin), lambda n, t: (0, 0, 0)),
                pl.BlockSpec((1, Cin), lambda n, t: (0, 0)),
                pl.BlockSpec((Cin, Cout_pad), lambda n, t: (0, 0)),
                pl.BlockSpec((1, Cout_pad), lambda n, t: (0, 0)),
            ],
            out_specs=pl.BlockSpec((None, tile_h, Wo_k, Cout_pad),
                                   lambda n, t: (n, t, 0, 0)),
            scratch_shapes=[pltpu.VMEM((body_rows + halo_rows, Wp_k, Cin), x.dtype)],
        ),
        compiler_params=pltpu.CompilerParams(
            dimension_semantics=("parallel", "parallel"),
            vmem_limit_bytes=32 * 1024 * 1024,
        ),
        cost_estimate=pl.CostEstimate(flops=flops, transcendentals=0,
                                      bytes_accessed=bytes_accessed),
    )(x_pad, x_pad, wdw, b_dw, wpw, b_pw)

    # drop the padded rows / columns / channels, back to NCHW
    return jnp.transpose(out_nhwc[:, :Ho, :Wo, :Cout], (0, 3, 1, 2))


def reference(x_nchw, w_dw, bn_dw, w_pw, bn_pw, *, stride=1, dilation=1, eps=1e-5):
    """Pure-JAX reference (lax conv), inference-mode BN."""
    Cin = x_nchw.shape[1]

    def bn(y, params):
        g, b, m, v = params
        shape = (1, -1, 1, 1)
        return (y - m.reshape(shape)) / jnp.sqrt(v.reshape(shape) + eps) \
            * g.reshape(shape) + b.reshape(shape)

    y = lax.conv_general_dilated(
        x_nchw, w_dw, window_strides=(stride, stride),
        padding=[(dilation, dilation)] * 2, rhs_dilation=(dilation, dilation),
        feature_group_count=Cin, dimension_numbers=('NCHW', 'OIHW', 'NCHW'))
    y = jnp.maximum(bn(y, bn_dw), 0.0)
    y = lax.conv_general_dilated(
        y, w_pw, window_strides=(1, 1), padding=[(0, 0), (0, 0)],
        dimension_numbers=('NCHW', 'OIHW', 'NCHW'))
    y = jnp.maximum(bn(y, bn_pw), 0.0)
    return y


if __name__ == "__main__":
    key = jax.random.PRNGKey(0)
    N, Cin, Cout, H, W = 2, 4, 8, 16, 16

    ks = jax.random.split(key, 11)
    x = jax.random.normal(ks[0], (N, Cin, H, W), jnp.float32)
    w_dw = jax.random.normal(ks[1], (Cin, 1, 3, 3), jnp.float32) * 0.3   # depthwise OIHW
    w_pw = jax.random.normal(ks[2], (Cout, Cin, 1, 1), jnp.float32) * 0.3  # pointwise OIHW
    # inference-mode BatchNorm params (non-trivial, to exercise the weight folding)
    bn_dw = (1.0 + 0.1 * jax.random.normal(ks[3], (Cin,)),
             0.1 * jax.random.normal(ks[4], (Cin,)),
             0.1 * jax.random.normal(ks[5], (Cin,)),
             0.5 + jnp.abs(jax.random.normal(ks[6], (Cin,))))
    bn_pw = (1.0 + 0.1 * jax.random.normal(ks[7], (Cout,)),
             0.1 * jax.random.normal(ks[8], (Cout,)),
             0.1 * jax.random.normal(ks[9], (Cout,)),
             0.5 + jnp.abs(jax.random.normal(ks[10], (Cout,))))

    # ---- stride=1, dilation=1: auto tile (single row-tile covers the image) ----
    ref = reference(x, w_dw, bn_dw, w_pw, bn_pw, stride=1, dilation=1)
    out = encode_basic_layer(x, w_dw, bn_dw, w_pw, bn_pw, stride=1, dilation=1)
    out = jax.block_until_ready(out)
    assert out.shape == (N, Cout, H, W), out.shape
    assert jnp.allclose(out, ref, rtol=1e-4, atol=1e-4), \
        float(jnp.max(jnp.abs(out - ref)))

    # ---- forced small tile -> grid=(N, 2), exercises the row-halo / multi-tile path ----
    out2 = encode_basic_layer(x, w_dw, bn_dw, w_pw, bn_pw,
                              stride=1, dilation=1, tile_h=8)
    out2 = jax.block_until_ready(out2)
    assert jnp.allclose(out2, ref, rtol=1e-4, atol=1e-4), \
        float(jnp.max(jnp.abs(out2 - ref)))

    # ---- dilation=2 (stride=1), multi-tile: exercises the 2*dilation-row halo path ----
    ref_d2 = reference(x, w_dw, bn_dw, w_pw, bn_pw, stride=1, dilation=2)
    out3 = encode_basic_layer(x, w_dw, bn_dw, w_pw, bn_pw,
                              stride=1, dilation=2, tile_h=8)
    out3 = jax.block_until_ready(out3)
    assert out3.shape == ref_d2.shape, (out3.shape, ref_d2.shape)
    assert jnp.allclose(out3, ref_d2, rtol=1e-4, atol=1e-4), \
        float(jnp.max(jnp.abs(out3 - ref_d2)))

    print("KERNEL_OK")
</pallas_src>

<mosaic_0001>
module attributes {stable_mosaic.version = 11 : i64} {
  func.func @_encode_basic_kernel(%arg0: i32, %arg1: i32, %arg2: memref<1x16x18x4xf32, #tpu.memory_space<vmem>>, %arg3: memref<1x2x18x4xf32, #tpu.memory_space<vmem>>, %arg4: memref<3x3x4xf32, #tpu.memory_space<vmem>>, %arg5: memref<1x4xf32, #tpu.memory_space<vmem>>, %arg6: memref<4x128xf32, #tpu.memory_space<vmem>>, %arg7: memref<1x128xf32, #tpu.memory_space<vmem>>, %arg8: memref<1x16x16x128xf32, #tpu.memory_space<vmem>>, %arg9: memref<18x18x4xf32, #tpu.memory_space<vmem>>) attributes {dimension_semantics = [#tpu.dimension_semantics<parallel>, #tpu.dimension_semantics<parallel>], iteration_bounds = array<i64: 2, 1>, scalar_prefetch = 0 : i64, scratch_operands = 1 : i64, tpu.core_type = #tpu.core_type<tc>, window_params = [{transform_indices = @transform_0, window_bounds = array<i64: 1, 16, 18, 4>}, {transform_indices = @transform_1, window_bounds = array<i64: 1, 2, 18, 4>}, {pipeline_mode = #tpu.pipeline_mode<synchronous>, transform_indices = @transform_2, window_bounds = array<i64: 3, 3, 4>}, {pipeline_mode = #tpu.pipeline_mode<synchronous>, transform_indices = @transform_3, window_bounds = array<i64: 1, 4>}, {pipeline_mode = #tpu.pipeline_mode<synchronous>, transform_indices = @transform_4, window_bounds = array<i64: 4, 128>}, {pipeline_mode = #tpu.pipeline_mode<synchronous>, transform_indices = @transform_5, window_bounds = array<i64: 1, 128>}, {transform_indices = @transform_6, window_bounds = array<i64: 1, 16, 16, 128>}]} {
    %c0 = arith.constant 0 : index
    %c0_0 = arith.constant 0 : index
    %c0_1 = arith.constant 0 : index
    %c0_2 = arith.constant 0 : index
    %0 = vector.load %arg2[%c0, %c0_0, %c0_1, %c0_2] : memref<1x16x18x4xf32, #tpu.memory_space<vmem>>, vector<1x16x18x4xf32>
    %1 = vector.shape_cast %0 : vector<1x16x18x4xf32> to vector<16x18x4xf32>
    %c0_3 = arith.constant 0 : index
    %c0_4 = arith.constant 0 : index
    %c0_5 = arith.constant 0 : index
    %2 = vector.load %arg9[%c0_3, %c0_4, %c0_5] : memref<18x18x4xf32, #tpu.memory_space<vmem>>, vector<16x18x4xf32>
    tpu.vector_store %arg9[%c0_3, %c0_4, %c0_5], %1 {strides = array<i32>} : memref<18x18x4xf32, #tpu.memory_space<vmem>>, vector<16x18x4xf32>,
    %c0_6 = arith.constant 0 : index
    %c0_7 = arith.constant 0 : index
    %c0_8 = arith.constant 0 : index
    %c0_9 = arith.constant 0 : index
    %3 = vector.load %arg3[%c0_6, %c0_7, %c0_8, %c0_9] : memref<1x2x18x4xf32, #tpu.memory_space<vmem>>, vector<1x2x18x4xf32>
    %4 = vector.shape_cast %3 : vector<1x2x18x4xf32> to vector<2x18x4xf32>
    %c16 = arith.constant 16 : index
    %c0_10 = arith.constant 0 : index
    %c0_11 = arith.constant 0 : index
    %5 = vector.load %arg9[%c16, %c0_10, %c0_11] : memref<18x18x4xf32, #tpu.memory_space<vmem>>, vector<2x18x4xf32>
    tpu.vector_store %arg9[%c16, %c0_10, %c0_11], %4 {strides = array<i32>} : memref<18x18x4xf32, #tpu.memory_space<vmem>>, vector<2x18x4xf32>,
    %c0_12 = arith.constant 0 : index
    %c0_13 = arith.constant 0 : index
    %c0_14 = arith.constant 0 : index
    %6 = vector.load %arg9[%c0_12, %c0_13, %c0_14] : memref<18x18x4xf32, #tpu.memory_space<vmem>>, vector<18x18x4xf32>
    %c0_15 = arith.constant 0 : index
    %c0_16 = arith.constant 0 : index
    %c0_17 = arith.constant 0 : index
    %7 = vector.load %arg4[%c0_15, %c0_16, %c0_17] : memref<3x3x4xf32, #tpu.memory_space<vmem>>, vector<3x3x4xf32>
    %8 = vector.extract_strided_slice %6 {offsets = [0, 0, 0], sizes = [18, 16, 4], strides = [1, 1, 1]} : vector<18x18x4xf32> to vector<18x16x4xf32>
    %9 = vector.extract_strided_slice %6 {offsets = [0, 1, 0], sizes = [18, 16, 4], strides = [1, 1, 1]} : vector<18x18x4xf32> to vector<18x16x4xf32>
    %10 = vector.extract_strided_slice %6 {offsets = [0, 2, 0], sizes = [18, 16, 4], strides = [1, 1, 1]} : vector<18x18x4xf32> to vector<18x16x4xf32>
    %cst = arith.constant 0.000000e+00 : f32
    %11 = vector.broadcast %cst : f32 to vector<16x16x4xf32>
    %12 = vector.extract_strided_slice %8 {offsets = [0, 0, 0], sizes = [16, 16, 4], strides = [1, 1, 1]} : vector<18x16x4xf32> to vector<16x16x4xf32>
    %13 = vector.extract_strided_slice %7 {offsets = [0, 0, 0], sizes = [1, 1, 4], strides = [1, 1, 1]} : vector<3x3x4xf32> to vector<1x1x4xf32>
    %14 = vector.shape_cast %13 : vector<1x1x4xf32> to vector<4xf32>
    %15 = vector.shape_cast %14 : vector<4xf32> to vector<1x1x4xf32>
    %16 = vector.broadcast %15 : vector<1x1x4xf32> to vector<16x16x4xf32>
    %17 = arith.mulf %12, %16 : vector<16x16x4xf32>
    %18 = arith.addf %11, %17 : vector<16x16x4xf32>
    %19 = vector.extract_strided_slice %9 {offsets = [0, 0, 0], sizes = [16, 16, 4], strides = [1, 1, 1]} : vector<18x16x4xf32> to vector<16x16x4xf32>
    %20 = vector.extract_strided_slice %7 {offsets = [0, 1, 0], sizes = [1, 1, 4], strides = [1, 1, 1]} : vector<3x3x4xf32> to vector<1x1x4xf32>
    %21 = vector.shape_cast %20 : vector<1x1x4xf32> to vector<4xf32>
    %22 = vector.shape_cast %21 : vector<4xf32> to vector<1x1x4xf32>
    %23 = vector.broadcast %22 : vector<1x1x4xf32> to vector<16x16x4xf32>
    %24 = arith.mulf %19, %23 : vector<16x16x4xf32>
    %25 = arith.addf %18, %24 : vector<16x16x4xf32>
    %26 = vector.extract_strided_slice %10 {offsets = [0, 0, 0], sizes = [16, 16, 4], strides = [1, 1, 1]} : vector<18x16x4xf32> to vector<16x16x4xf32>
    %27 = vector.extract_strided_slice %7 {offsets = [0, 2, 0], sizes = [1, 1, 4], strides = [1, 1, 1]} : vector<3x3x4xf32> to vector<1x1x4xf32>
    %28 = vector.shape_cast %27 : vector<1x1x4xf32> to vector<4xf32>
    %29 = vector.shape_cast %28 : vector<4xf32> to vector<1x1x4xf32>
    %30 = vector.broadcast %29 : vector<1x1x4xf32> to vector<16x16x4xf32>
    %31 = arith.mulf %26, %30 : vector<16x16x4xf32>
    %32 = arith.addf %25, %31 : vector<16x16x4xf32>
    %33 = vector.extract_strided_slice %8 {offsets = [1, 0, 0], sizes = [16, 16, 4], strides = [1, 1, 1]} : vector<18x16x4xf32> to vector<16x16x4xf32>
    %34 = vector.extract_strided_slice %7 {offsets = [1, 0, 0], sizes = [1, 1, 4], strides = [1, 1, 1]} : vector<3x3x4xf32> to vector<1x1x4xf32>
    %35 = vector.shape_cast %34 : vector<1x1x4xf32> to vector<4xf32>
    %36 = vector.shape_cast %35 : vector<4xf32> to vector<1x1x4xf32>
    %37 = vector.broadcast %36 : vector<1x1x4xf32> to vector<16x16x4xf32>
    %38 = arith.mulf %33, %37 : vector<16x16x4xf32>
    %39 = arith.addf %32, %38 : vector<16x16x4xf32>
    %40 = vector.extract_strided_slice %9 {offsets = [1, 0, 0], sizes = [16, 16, 4], strides = [1, 1, 1]} : vector<18x16x4xf32> to vector<16x16x4xf32>
    %41 = vector.extract_strided_slice %7 {offsets = [1, 1, 0], sizes = [1, 1, 4], strides = [1, 1, 1]} : vector<3x3x4xf32> to vector<1x1x4xf32>
    %42 = vector.shape_cast %41 : vector<1x1x4xf32> to vector<4xf32>
    %43 = vector.shape_cast %42 : vector<4xf32> to vector<1x1x4xf32>
    %44 = vector.broadcast %43 : vector<1x1x4xf32> to vector<16x16x4xf32>
    %45 = arith.mulf %40, %44 : vector<16x16x4xf32>
    %46 = arith.addf %39, %45 : vector<16x16x4xf32>
    %47 = vector.extract_strided_slice %10 {offsets = [1, 0, 0], sizes = [16, 16, 4], strides = [1, 1, 1]} : vector<18x16x4xf32> to vector<16x16x4xf32>
    %48 = vector.extract_strided_slice %7 {offsets = [1, 2, 0], sizes = [1, 1, 4], strides = [1, 1, 1]} : vector<3x3x4xf32> to vector<1x1x4xf32>
    %49 = vector.shape_cast %48 : vector<1x1x4xf32> to vector<4xf32>
    %50 = vector.shape_cast %49 : vector<4xf32> to vector<1x1x4xf32>
    %51 = vector.broadcast %50 : vector<1x1x4xf32> to vector<16x16x4xf32>
    %52 = arith.mulf %47, %51 : vector<16x16x4xf32>
    %53 = arith.addf %46, %52 : vector<16x16x4xf32>
    %54 = vector.extract_strided_slice %8 {offsets = [2, 0, 0], sizes = [16, 16, 4], strides = [1, 1, 1]} : vector<18x16x4xf32> to vector<16x16x4xf32>
    %55 = vector.extract_strided_slice %7 {offsets = [2, 0, 0], sizes = [1, 1, 4], strides = [1, 1, 1]} : vector<3x3x4xf32> to vector<1x1x4xf32>
    %56 = vector.shape_cast %55 : vector<1x1x4xf32> to vector<4xf32>
    %57 = vector.shape_cast %56 : vector<4xf32> to vector<1x1x4xf32>
    %58 = vector.broadcast %57 : vector<1x1x4xf32> to vector<16x16x4xf32>
    %59 = arith.mulf %54, %58 : vector<16x16x4xf32>
    %60 = arith.addf %53, %59 : vector<16x16x4xf32>
    %61 = vector.extract_strided_slice %9 {offsets = [2, 0, 0], sizes = [16, 16, 4], strides = [1, 1, 1]} : vector<18x16x4xf32> to vector<16x16x4xf32>
    %62 = vector.extract_strided_slice %7 {offsets = [2, 1, 0], sizes = [1, 1, 4], strides = [1, 1, 1]} : vector<3x3x4xf32> to vector<1x1x4xf32>
    %63 = vector.shape_cast %62 : vector<1x1x4xf32> to vector<4xf32>
    %64 = vector.shape_cast %63 : vector<4xf32> to vector<1x1x4xf32>
    %65 = vector.broadcast %64 : vector<1x1x4xf32> to vector<16x16x4xf32>
    %66 = arith.mulf %61, %65 : vector<16x16x4xf32>
    %67 = arith.addf %60, %66 : vector<16x16x4xf32>
    %68 = vector.extract_strided_slice %10 {offsets = [2, 0, 0], sizes = [16, 16, 4], strides = [1, 1, 1]} : vector<18x16x4xf32> to vector<16x16x4xf32>
    %69 = vector.extract_strided_slice %7 {offsets = [2, 2, 0], sizes = [1, 1, 4], strides = [1, 1, 1]} : vector<3x3x4xf32> to vector<1x1x4xf32>
    %70 = vector.shape_cast %69 : vector<1x1x4xf32> to vector<4xf32>
    %71 = vector.shape_cast %70 : vector<4xf32> to vector<1x1x4xf32>
    %72 = vector.broadcast %71 : vector<1x1x4xf32> to vector<16x16x4xf32>
    %73 = arith.mulf %68, %72 : vector<16x16x4xf32>
    %74 = arith.addf %67, %73 : vector<16x16x4xf32>
    %c0_18 = arith.constant 0 : index
    %c0_19 = arith.constant 0 : index
    %75 = vector.load %arg5[%c0_18, %c0_19] : memref<1x4xf32, #tpu.memory_space<vmem>>, vector<1x4xf32>
    %76 = vector.shape_cast %75 : vector<1x4xf32> to vector<4xf32>
    %77 = vector.shape_cast %76 : vector<4xf32> to vector<1x1x4xf32>
    %78 = vector.broadcast %77 : vector<1x1x4xf32> to vector<16x16x4xf32>
    %79 = arith.addf %74, %78 : vector<16x16x4xf32>
    %cst_20 = arith.constant 0.000000e+00 : f32
    %80 = vector.broadcast %cst_20 : f32 to vector<16x16x4xf32>
    %81 = arith.maximumf %79, %80 : vector<16x16x4xf32>
    %c0_21 = arith.constant 0 : index
    %c0_22 = arith.constant 0 : index
    %82 = vector.load %arg6[%c0_21, %c0_22] : memref<4x128xf32, #tpu.memory_space<vmem>>, vector<4x128xf32>
    %83 = vector.shape_cast %81 : vector<16x16x4xf32> to vector<256x4xf32>
    %cst_23 = arith.constant dense<0.000000e+00> : vector<256x128xf32>
    %84 = tpu.matmul %83, %82, %cst_23 {dimension_numbers = #tpu.dot_dimension_numbers<[1], [0], [0], [1], [0, 0, 1, 1], [], []>} : vector<256x4xf32>, vector<4x128xf32>, vector<256x128xf32> -> vector<256x128xf32>
    %c0_24 = arith.constant 0 : index
    %c0_25 = arith.constant 0 : index
    %85 = vector.load %arg7[%c0_24, %c0_25] : memref<1x128xf32, #tpu.memory_space<vmem>>, vector<1x128xf32>
    %86 = vector.shape_cast %85 : vector<1x128xf32> to vector<128xf32>
    %87 = vector.shape_cast %86 : vector<128xf32> to vector<1x128xf32>
    %88 = vector.broadcast %87 : vector<1x128xf32> to vector<256x128xf32>
    %89 = arith.addf %84, %88 : vector<256x128xf32>
    %cst_26 = arith.constant 0.000000e+00 : f32
    %90 = vector.broadcast %cst_26 : f32 to vector<256x128xf32>
    %91 = arith.maximumf %89, %90 : vector<256x128xf32>
    %92 = vector.shape_cast %91 : vector<256x128xf32> to vector<16x16x128xf32>
    %c0_27 = arith.constant 0 : index
    %c0_28 = arith.constant 0 : index
    %c0_29 = arith.constant 0 : index
    %c0_30 = arith.constant 0 : index
    %93 = vector.load %arg8[%c0_27, %c0_28, %c0_29, %c0_30] : memref<1x16x16x128xf32, #tpu.memory_space<vmem>>, vector<1x16x16x128xf32>
    %94 = vector.shape_cast %93 : vector<1x16x16x128xf32> to vector<16x16x128xf32>
    %95 = vector.shape_cast %92 : vector<16x16x128xf32> to vector<1x16x16x128xf32>
    tpu.vector_store %arg8[%c0_27, %c0_28, %c0_29, %c0_30], %95 {strides = array<i32>} : memref<1x16x16x128xf32, #tpu.memory_space<vmem>>, vector<1x16x16x128xf32>,
    return
  }
  func.func @transform_0(%arg0: i32, %arg1: i32) -> (i32, i32, i32, i32) {
    %c0_i32 = arith.constant 0 : i32
    %c0_i32_0 = arith.constant 0 : i32
    %c0_i32_1 = arith.constant 0 : i32
    return %arg0, %arg1, %c0_i32, %c0_i32_0 : i32, i32, i32, i32
  }
  func.func @transform_1(%arg0: i32, %arg1: i32) -> (i32, i32, i32, i32) {
    %c1_i32 = arith.constant 1 : i32
    %0 = arith.addi %arg1, %c1_i32 : i32
    %c8_i32 = arith.constant 8 : i32
    %1 = arith.muli %0, %c8_i32 : i32
    %c0_i32 = arith.constant 0 : i32
    %c0_i32_0 = arith.constant 0 : i32
    %c0_i32_1 = arith.constant 0 : i32
    return %arg0, %1, %c0_i32, %c0_i32_0 : i32, i32, i32, i32
  }
  func.func @transform_2(%arg0: i32, %arg1: i32) -> (i32, i32, i32) {
    %c0_i32 = arith.constant 0 : i32
    %c0_i32_0 = arith.constant 0 : i32
    %c0_i32_1 = arith.constant 0 : i32
    %c0_i32_2 = arith.constant 0 : i32
    return %c0_i32, %c0_i32_0, %c0_i32_1 : i32, i32, i32
  }
  func.func @transform_3(%arg0: i32, %arg1: i32) -> (i32, i32) {
    %c0_i32 = arith.constant 0 : i32
    %c0_i32_0 = arith.constant 0 : i32
    %c0_i32_1 = arith.constant 0 : i32
    return %c0_i32, %c0_i32_0 : i32, i32
  }
  func.func @transform_4(%arg0: i32, %arg1: i32) -> (i32, i32) {
    %c0_i32 = arith.constant 0 : i32
    %c0_i32_0 = arith.constant 0 : i32
    %c0_i32_1 = arith.constant 0 : i32
    return %c0_i32, %c0_i32_0 : i32, i32
  }
  func.func @transform_5(%arg0: i32, %arg1: i32) -> (i32, i32) {
    %c0_i32 = arith.constant 0 : i32
    %c0_i32_0 = arith.constant 0 : i32
    %c0_i32_1 = arith.constant 0 : i32
    return %c0_i32, %c0_i32_0 : i32, i32
  }
  func.func @transform_6(%arg0: i32, %arg1: i32) -> (i32, i32, i32, i32) {
    %c0_i32 = arith.constant 0 : i32
    %c0_i32_0 = arith.constant 0 : i32
    %c0_i32_1 = arith.constant 0 : i32
    return %arg0, %arg1, %c0_i32, %c0_i32_0 : i32, i32, i32, i32
  }
}

</mosaic_0001>

<bundles_post_ra>
// kernel: tpu_custom_call.1
= control target key start
LH: loop header
LB: loop body
LE: loop exit
PB: predicated region body
PF: predicated region fallthrough
CT: control target
= control target key end

     0   :  { %11 = vsyncpa [#allocation4], 0  ;;  %s5263_s0 = inlined_call_operand.vmem [shape: f32[2,18,18,4], index: 0, kind: input, shape index: {}]   ;;  %s5264_s1 = inlined_call_operand.vmem [shape: f32[2,18,18,4], index: 1, kind: input, shape index: {}]   ;;  %s5265_s2 = inlined_call_operand.vmem [shape: f32[3,3,4], index: 2, kind: input, shape index: {}]   ;;  %s5266_s3 = inlined_call_operand.vmem [shape: f32[1,4], index: 3, kind: input, shape index: {}]   ;;  %s5267_s4 = inlined_call_operand.vmem [shape: f32[4,128], index: 4, kind: input, shape index: {}]   ;;  %s5268_s5 = inlined_call_operand.vmem [shape: f32[1,128], index: 5, kind: input, shape index: {}]   ;;  %s5269_s6 = inlined_call_operand.hbm [shape: f32[2,16,16,128], index: 6, kind: output, shape index: {}]  }
   0x1   :  { %13 = vsyncpa [#allocation4 + $0x1], 0  ;;  %s3110_s21 = smov 0   ;;  %s3112_s22 = smov 0  }
   0x2   :  { %s3114_s23 = smov 0   ;;  %s3116_s24 = smov 0  }
   0x3   :  { %s3118_s25 = smov 0   ;;  %s3120_s26 = smov 0  }
   0x4 LB: > { %s2788_s27 = sadd.s32 4294967295, %s3070_s26   ;;  %s2789_s28 = sadd.s32 4294967294, %s3070_s26   ;;  %s3070_s26 = sphi %s3120_s26, %s19_s26   ;;  %s3066_s25 = sphi %s3118_s25, %s5330_s25   ;;  %s3062_s24 = sphi %s3116_s24, %s5329_s24   ;;  %s3058_s23 = sphi %s3114_s23, %s5328_s23   ;;  %s3054_s22 = sphi %s3112_s22, %s5327_s22   ;;  %s3050_s21 = sphi %s3110_s21, %s5326_s21  }
   0x5   : > { %s31_s29 = sadd.s32 1, %s3066_s25  ;;  %s184_s30 = sadd.s32 1, %s3058_s23 }
   0x6   : > { %p33_p0 = scmp.ge.s32.totalorder %s31_s29, 2  ;;  %p194_p1 = scmp.ne.s32.totalorder %s3058_s23, %s3054_s22 }
   0x7   : > { %p195_p2 = scmp.eq.s32.totalorder %s2788_s27, 1  ;;  %p200_p3 = scmp.ne.s32.totalorder %s3054_s22, %s3050_s21 }
   0x8   : > { %s5332_s29 = smov (%p33_p0, %s31_s29), 0  ;;  %p201_p5 = scmp.eq.s32.totalorder %s2789_s28, 1 }
   0x9   : > { %p3150_p4 = por %p195_p2, %p194_p1  ;;  %s179_s8 = ssub.s32 %s3066_s25, %s5332_s29 }
   0xa   : > { %p2792_p6 = scmp.ge.s32.totalorder %s3070_s26, 1  ;;  %p182_p7 = scmp.eq.s32.totalorder %s179_s8, 0 }
   0xb   : > { %p3157_p8 = por %p201_p5, %p200_p3  ;;  %p273_p9 = scmp.lt.s32.totalorder %s3070_s26, 3 }
   0xc   : > { %s3163_s10 = scalar_select %p182_p7, %s3058_s23, %s184_s30  }
   0xd   : > { %p274_p10 = pnand %p2792_p6, %p273_p9 }
   0xe   : > { %v2271_v0 = vld [vmem:[%s5267_s4] sm:$0xf] (!%p274_p10)  ;;  %vm2375_vm0 = vcmask (!%p274_p10), 1043456   ;;  %p331_p11 = scmp.lt.s32.totalorder (!%p274_p10), %s3062_s24, 1  ;;  %v530_v1 = vlaneseq (!%p274_p10)  ;;  %vm410_vm1 = vcmask (!%p274_p10), 31744   ;;  %vm413_vm2 = vcmask (!%p274_p10), 25600  }
   0xf   : > { %277 = sbr.rel (%p274_p10) target bundleno = 585 (0x249), region = 44  ;;  %2872 = vmatprep.subr.msk.mxu0 (!%p274_p10), %vm2375_vm0, %v2271_v0  ;;  %2922 = vmatprep.subr.msk.mxu1 (!%p274_p10), %vm2375_vm0, %v2271_v0  ;;  %v527_v6 = vld [vmem:[%s5265_s2] sm:$0x7] (!%p274_p10)  ;;  %v528_v10 = vld [vmem:[%s5265_s2 + $0x4] sm:$0x7] (!%p274_p10)  ;;  %vm698_vm3 = vcmask (!%p274_p10), 1046528  }
  0x10   : > { %2873 = vmatpush3.msk.msra.mxu0 (!%p274_p10), %vm2375_vm0, %v2271_v0  ;;  %2923 = vmatpush3.msk.msra.mxu1 (!%p274_p10), %vm2375_vm0, %v2271_v0  ;;  %v531_v2 = vshrl.u32 (!%p274_p10), %v530_v1, 7  ;;  %v529_v17 = vld [vmem:[%s5265_s2 + $0x8] sm:$0x7] (!%p274_p10)  ;;  %vm943_vm4 = vcmask (!%p274_p10), 1045504   ;;  %s322_s20 = sand.u32 (!%p274_p10), 1, %s3054_s22   ;;  %s2838_s11 = sshll.u32 (!%p274_p10), %s3062_s24, 12 }
  0x11   : > { %s2793_s30 = sshll.u32 (!%p274_p10), %s322_s20, 8 }
  0x12   : > { %v532_v11 = vsub.s32 (!%p274_p10), 0, %v531_v2  ;;  %v600_v12 = vsub.s32 (!%p274_p10), 1, %v531_v2  ;;  %v845_v13 = vsub.s32 (!%p274_p10), 2, %v531_v2  ;;  %s5135_s8 = scalar_lea.vmem (!%p274_p10), [#allocation3], %s2793_s30 }
  0x14   : > { %v3216_v24 = vrot.slane (!%p274_p10), %v527_v6, %v532_v11  ;;  %v3218_v25 = vrot.slane (!%p274_p10), %v527_v6, %v600_v12  ;;  %v3220_v26 = vrot.slane (!%p274_p10), %v527_v6, %v845_v13  ;;  %v3228_v30 = vrot.slane (!%p274_p10), %v528_v10, %v532_v11 }
  0x15   : > { %v3230_v31 = vrot.slane (!%p274_p10), %v528_v10, %v600_v12  ;;  %v3238_v35 = vrot.slane (!%p274_p10), %v528_v10, %v845_v13  ;;  %v3248_v41 = vrot.slane (!%p274_p10), %v529_v17, %v532_v11  ;;  %v3250_v42 = vrot.slane (!%p274_p10), %v529_v17, %v600_v12 }
  0x16   : > { %s3170_s13 = scalar_select %p331_p11, %s3062_s24, 1  ;;  %v3252_v43 = vrot.slane %v529_v17, %v845_v13 }
  0x17   : > { %s5217_s24 = scalar_lea.sflag [#allocation4], %s322_s20 }
  0x18   : > { %s2924_s14 = smul.u32 432, %s3170_s13 }
  0x1a   : > { %s3178_s17 = scalar_lea.vmem %s5263_s0, %s2924_s14  ;;  %s2837_s12 = sadd.s32 384, %s2924_s14 }
  0x1b   : > { %v362_v3 = vld [vmem:[%s3178_s17] sm:$0xff]  ;;  %v363_v4 = vld [vmem:[%s3178_s17 + $0x8] sm:$0xff]  ;;  %v365_v5 = vld [vmem:[%s3178_s17 + $0x18] sm:$0xff]  ;;  %s3072_s14 = smov [#allocation3]  }
  0x1c   : > { %v366_v7 = vld [vmem:[%s3178_s17 + $0x20] sm:$0xff]  ;;  %v368_v8 = vld [vmem:[%s3178_s17 + $0x30] sm:$0xff]  ;;  %v369_v9 = vld [vmem:[%s3178_s17 + $0x38] sm:$0xff]  ;;  %411 = vst.msk [vmem:[#allocation2] sm:$0xff] %vm410_vm1, %v362_v3  ;;  %s2996_s18 = sshll.u32 %s3072_s14, 4  ;;  %s2997_s18 = int_to_ptr.vmem [resolvable:$false] %s2996_s18 }
  0x1d   : > { %412 = vst.msk [vmem:[#allocation2 + $0x8] sm:$0xff] %vm410_vm1, %v363_v4  ;;  %415 = vst.msk [vmem:[#allocation2 + $0x18] sm:$0xff] %vm410_vm1, %v365_v5  ;;  %v386_v14 = vld [vmem:[%s3178_s17 + $0xc0] sm:$0xff]  ;;  %v387_v15 = vld [vmem:[%s3178_s17 + $0xc8] sm:$0xff]  ;;  %s2998_s19 = scalar_lea.vmem %s2997_s18, 8192 }
  0x1e   : > { %416 = vst.msk [vmem:[#allocation2 + $0x20] sm:$0xff] %vm410_vm1, %v366_v7  ;;  %418 = vst.msk [vmem:[#allocation2 + $0x30] sm:$0xff] %vm410_vm1, %v368_v8  ;;  %v389_v16 = vld [vmem:[%s3178_s17 + $0xd8] sm:$0xff]  ;;  %v390_v18 = vld [vmem:[%s3178_s17 + $0xe0] sm:$0xff] }
  0x1f   : > { %419 = vst.msk [vmem:[#allocation2 + $0x38] sm:$0xff] %vm410_vm1, %v369_v9  ;;  %v392_v19 = vld [vmem:[%s3178_s17 + $0xf0] sm:$0xff]  ;;  %v393_v20 = vld [vmem:[%s3178_s17 + $0xf8] sm:$0xff]  ;;  %436 = vst.msk [vmem:[#allocation2 + $0xc0] sm:$0xff] %vm410_vm1, %v386_v14 }
  0x20   : > { %437 = vst.msk [vmem:[#allocation2 + $0xc8] sm:$0xff] %vm410_vm1, %v387_v15  ;;  %439 = vst.msk [vmem:[#allocation2 + $0xd8] sm:$0xff] %vm410_vm1, %v389_v16  ;;  %v364_v21 = vld [vmem:[%s3178_s17 + $0x10] sm:$0x3]  ;;  %v367_v22 = vld [vmem:[%s3178_s17 + $0x28] sm:$0x3] }
  0x21   : > { %440 = vst.msk [vmem:[#allocation2 + $0xe0] sm:$0xff] %vm410_vm1, %v390_v18  ;;  %442 = vst.msk [vmem:[#allocation2 + $0xf0] sm:$0xff] %vm410_vm1, %v392_v19  ;;  %v370_v23 = vld [vmem:[%s3178_s17 + $0x40] sm:$0x3]  ;;  %v388_v27 = vld [vmem:[%s3178_s17 + $0xd0] sm:$0x3] }
  0x22   : > { %443 = vst.msk [vmem:[#allocation2 + $0xf8] sm:$0xff] %vm410_vm1, %v393_v20  ;;  %v391_v28 = vld [vmem:[%s3178_s17 + $0xe8] sm:$0x3]  ;;  %v394_v29 = vld [vmem:[%s3178_s17 + $0x100] sm:$0x3]  ;;  %v372_v33 = vld [vmem:[%s3178_s17 + $0x50] sm:$0xff] }
  0x23   : > { %414 = vst.msk [vmem:[#allocation2 + $0x10] sm:$0x3] %vm413_vm2, %v364_v21  ;;  %417 = vst.msk [vmem:[#allocation2 + $0x28] sm:$0x3] %vm413_vm2, %v367_v22  ;;  %v371_v32 = vld [vmem:[%s3178_s17 + $0x48] sm:$0xff]  ;;  %v396_v36 = vld [vmem:[%s3178_s17 + $0x110] sm:$0xff] }
  0x24   : > { %420 = vst.msk [vmem:[#allocation2 + $0x40] sm:$0x3] %vm413_vm2, %v370_v23  ;;  %438 = vst.msk [vmem:[#allocation2 + $0xd0] sm:$0x3] %vm413_vm2, %v388_v27  ;;  %v395_v34 = vld [vmem:[%s3178_s17 + $0x108] sm:$0xff]  ;;  %v473_v39 = vld [vmem:[#allocation2] sm:$0xff] }
  0x25   : > { %441 = vst.msk [vmem:[#allocation2 + $0xe8] sm:$0x3] %vm413_vm2, %v391_v28  ;;  %444 = vst.msk [vmem:[#allocation2 + $0x100] sm:$0x3] %vm413_vm2, %v394_v29  ;;  %v373_v37 = vld [vmem:[%s3178_s17 + $0x58] sm:$0x3]  ;;  %v534_v46 = vmul.f32 %v3216_v24, %v473_v39  ;;  %v602_v47 = vmul.f32 %v3218_v25, %v473_v39  ;;  %v847_v49 = vmul.f32 %v3220_v26, %v473_v39 }
  0x26   : > { %421 = vst.msk [vmem:[#allocation2 + $0x48] sm:$0xff] %vm410_vm1, %v371_v32  ;;  %422 = vst.msk [vmem:[#allocation2 + $0x50] sm:$0xff] %vm410_vm1, %v372_v33  ;;  %v397_v38 = vld [vmem:[%s3178_s17 + $0x118] sm:$0x3]  ;;  %v3246_v40 = vld [vmem:[#allocation2 + $0x8] sm:$0xff] }
  0x27   : > { %445 = vst.msk [vmem:[#allocation2 + $0x108] sm:$0xff] %vm410_vm1, %v395_v34  ;;  %446 = vst.msk [vmem:[#allocation2 + $0x110] sm:$0xff] %vm410_vm1, %v396_v36  ;;  %v3257_v44 = vld [vmem:[#allocation2 + $0x18] sm:$0xff]  ;;  %v3259_v45 = vld [vmem:[#allocation2 + $0x20] sm:$0xff]  ;;  %v3265_v48 = vmul.f32 %v3218_v25, %v3246_v40  ;;  %v3270_v50 = vmul.f32 %v3220_v26, %v3246_v40  ;;  %v699_v54 = vrot.slane %v602_v47, 1  ;;  %v944_v56 = vrot.slane %v847_v49, 2 }
  0x28   : > { %423 = vst.msk [vmem:[#allocation2 + $0x58] sm:$0x3] %vm413_vm2, %v373_v37  ;;  %447 = vst.msk [vmem:[#allocation2 + $0x118] sm:$0x3] %vm413_vm2, %v397_v38  ;;  %v1092_v51 = vmul.f32 %v3228_v30, %v3257_v44  ;;  %v1160_v52 = vmul.f32 %v3230_v31, %v3257_v44  ;;  %v3278_v53 = vmul.f32 %v3230_v31, %v3259_v45  ;;  %v3283_v58 = vld [vmem:[#allocation2 + $0x30] sm:$0xff]  ;;  %v374_v63 = vld [vmem:[%s3178_s17 + $0x60] sm:$0xff] }
  0x29   : > { %v700_v55 = vrot.slane %v3265_v48, 1  ;;  %v1404_v57 = vmul.f32 %v3238_v35, %v3257_v44  ;;  %v945_v59 = vrot.slane %v3270_v50, 2  ;;  %v3289_v62 = vmul.f32 %v3238_v35, %v3259_v45  ;;  %v497_v4 = vld [vmem:[#allocation2 + $0xc0] sm:$0xff]  ;;  %v375_v5 = vld [vmem:[%s3178_s17 + $0x68] sm:$0xff]  ;;  %424 = vst.msk [vmem:[#allocation2 + $0x60] sm:$0xff] %vm410_vm1, %v374_v63  ;;  %v3303_v6 = vld [vmem:[#allocation2 + $0x38] sm:$0xff] }
  0x2a   : > { %v1256_v60 = vrot.slane %v1160_v52, 1  ;;  %v1257_v61 = vrot.slane %v3278_v53, 1  ;;  %v3297_v2 = vmul.f32 %v3248_v41, %v3283_v58  ;;  %v1716_v3 = vmul.f32 %v3250_v42, %v3283_v58  ;;  %v3312_v11 = vld [vmem:[#allocation2 + $0xc8] sm:$0xff]  ;;  %425 = vst.msk [vmem:[#allocation2 + $0x68] sm:$0xff] %vm410_vm1, %v375_v5  ;;  %v3328_v18 = vld [vmem:[#allocation2 + $0xd8] sm:$0xff]  ;;  %v398_v28 = vld [vmem:[%s3178_s17 + $0x120] sm:$0xff] }
  0x2b   : > { %v701_v0 = vsel %vm698_vm3, %v699_v54, %v700_v55  ;;  %v1500_v1 = vrot.slane %v1404_v57, 2  ;;  %v946_v8 = vsel %vm943_vm4, %v944_v56, %v945_v59  ;;  %v1501_v10 = vrot.slane %v3289_v62, 2  ;;  %v399_v29 = vld [vmem:[%s3178_s17 + $0x128] sm:$0xff]  ;;  %v377_v32 = vld [vmem:[%s3178_s17 + $0x78] sm:$0xff]  ;;  %448 = vst.msk [vmem:[#allocation2 + $0x120] sm:$0xff] %vm410_vm1, %v398_v28  ;;  %v402_v56 = vld [vmem:[%s3178_s17 + $0x140] sm:$0xff] }
  0x2c   : > { %v811_v7 = vadd.f32 %v701_v0, %v534_v46  ;;  %v1258_v9 = vsel %vm698_vm3, %v1256_v60, %v1257_v61  ;;  %v3317_v12 = vmul.f32 %v3250_v42, %v3303_v6  ;;  %v1812_v13 = vrot.slane %v1716_v3, 1  ;;  %449 = vst.msk [vmem:[#allocation2 + $0x128] sm:$0xff] %vm410_vm1, %v399_v29  ;;  %v376_v38 = vld [vmem:[%s3178_s17 + $0x70] sm:$0x3]  ;;  %v378_v46 = vld [vmem:[%s3178_s17 + $0x80] sm:$0xff]  ;;  %427 = vst.msk [vmem:[#allocation2 + $0x78] sm:$0xff] %vm410_vm1, %v377_v32 }
  0x2d   : > { %v1960_v14 = vmul.f32 %v3252_v43, %v3283_v58  ;;  %v3323_v15 = vmul.f32 %v3252_v43, %v3303_v6  ;;  %v1502_v17 = vsel %vm943_vm4, %v1500_v1, %v1501_v10  ;;  %v550_v19 = vmul.f32 %v3216_v24, %v497_v4  ;;  %v400_v39 = vld [vmem:[%s3178_s17 + $0x130] sm:$0x3]  ;;  %426 = vst.msk [vmem:[#allocation2 + $0x70] sm:$0x3] %vm413_vm2, %v376_v38  ;;  %v401_v54 = vld [vmem:[%s3178_s17 + $0x138] sm:$0xff]  ;;  %v3367_v63 = vld [vmem:[#allocation2 + $0xe0] sm:$0xff] }
  0x2e   : > { %v1056_v16 = vadd.f32 %v946_v8, %v811_v7  ;;  %v626_v20 = vmul.f32 %v3218_v25, %v497_v4  ;;  %v1813_v21 = vrot.slane %v3317_v12, 1  ;;  %v3336_v27 = vmul.f32 %v3218_v25, %v3312_v11  ;;  %450 = vst.msk [vmem:[#allocation2 + $0x130] sm:$0x3] %vm413_vm2, %v400_v39  ;;  %v379_v57 = vld [vmem:[%s3178_s17 + $0x88] sm:$0x3]  ;;  %v380_v5 = vld [vmem:[%s3178_s17 + $0x90] sm:$0xff] }
  0x2f   : > { %v2056_v22 = vrot.slane %v1960_v14, 2  ;;  %v2057_v23 = vrot.slane %v3323_v15, 2  ;;  %v871_v36 = vmul.f32 %v3220_v26, %v497_v4  ;;  %v3344_v37 = vmul.f32 %v3220_v26, %v3312_v11  ;;  %428 = vst.msk [vmem:[#allocation2 + $0x80] sm:$0xff] %vm410_vm1, %v378_v46  ;;  %451 = vst.msk [vmem:[#allocation2 + $0x138] sm:$0xff] %vm410_vm1, %v401_v54  ;;  %v403_v4 = vld [vmem:[%s3178_s17 + $0x148] sm:$0x3] }
  0x30   : > { %v1124_v33 = vadd.f32 %v1092_v51, %v1056_v16  ;;  %v739_v34 = vrot.slane %v626_v20, 1  ;;  %v1814_v47 = vsel %vm698_vm3, %v1812_v13, %v1813_v21  ;;  %v740_v51 = vrot.slane %v3336_v27, 1  ;;  %452 = vst.msk [vmem:[#allocation2 + $0x140] sm:$0xff] %vm410_vm1, %v402_v56  ;;  %v381_v14 = vld [vmem:[%s3178_s17 + $0x98] sm:$0xff]  ;;  %430 = vst.msk [vmem:[#allocation2 + $0x90] sm:$0xff] %vm410_vm1, %v380_v5  ;;  %v3393_v20 = vld [vmem:[#allocation2 + $0xf0] sm:$0xff] }
  0x31   : > { %v2058_v49 = vsel %vm943_vm4, %v2056_v22, %v2057_v23  ;;  %v1108_v52 = vmul.f32 %v3228_v30, %v3328_v18  ;;  %v984_v0 = vrot.slane %v871_v36, 2  ;;  %v985_v1 = vrot.slane %v3344_v37, 2  ;;  %429 = vst.msk [vmem:[#allocation2 + $0x88] sm:$0x3] %vm413_vm2, %v379_v57  ;;  %453 = vst.msk [vmem:[#allocation2 + $0x148] sm:$0x3] %vm413_vm2, %v403_v4 }
  0x32   : > { %v1368_v60 = vadd.f32 %v1258_v9, %v1124_v33  ;;  %v1184_v3 = vmul.f32 %v3230_v31, %v3328_v18  ;;  %v741_v7 = vsel %vm698_vm3, %v739_v34, %v740_v51  ;;  %v3382_v8 = vmul.f32 %v3230_v31, %v3367_v63  ;;  %431 = vst.msk [vmem:[#allocation2 + $0x98] sm:$0xff] %vm410_vm1, %v381_v14  ;;  %v3399_v32 = vld [vmem:[#allocation2 + $0xf8] sm:$0xff]  ;;  %v475_v54 = vld [vmem:[#allocation2 + $0x10] sm:$0x3] }
  0x33   : > { %v1428_v9 = vmul.f32 %v3238_v35, %v3328_v18  ;;  %v3388_v13 = vmul.f32 %v3238_v35, %v3367_v63  ;;  %v827_v22 = vadd.f32 %v741_v7, %v550_v19  ;;  %v986_v28 = vsel %vm943_vm4, %v984_v0, %v985_v1  ;;  %v3428_v7 = vld [vmem:[%s5266_s3] ss:$0 sm:$0xff] }
  0x34   : > { %v1612_v16 = vadd.f32 %v1502_v17, %v1368_v60  ;;  %v1296_v29 = vrot.slane %v1184_v3, 1  ;;  %v1297_v33 = vrot.slane %v3382_v8, 1  ;;  %v1664_v17 = vmul.f32 %v3248_v41, %v3393_v20 }
  0x35   : > { %v1540_v34 = vrot.slane %v1428_v9, 2  ;;  %v5272_v36 = vrot.slane %v3388_v13, 2  ;;  %v1072_v19 = vadd.f32 %v986_v28, %v827_v22  ;;  %v1740_v39 = vmul.f32 %v3250_v42, %v3393_v20 }
  0x36   : > { %v1680_v38 = vadd.f32 %v3297_v2, %v1612_v16  ;;  %v3410_v46 = vmul.f32 %v3250_v42, %v3399_v32  ;;  %v1298_v56 = vsel %vm698_vm3, %v1296_v29, %v1297_v33  ;;  %v1984_v2 = vmul.f32 %v3252_v43, %v3393_v20  ;;  %v3437_v29 = vld [vmem:[#allocation2 + $0x28] sm:$0x3] }
  0x37   : > { %v1542_v57 = vsel %vm943_vm4, %v1540_v34, %v5272_v36  ;;  %v3422_v60 = vmul.f32 %v3252_v43, %v3399_v32  ;;  %v1140_v3 = vadd.f32 %v1108_v52, %v1072_v19  ;;  %v1852_v4 = vrot.slane %v1740_v39, 1  ;;  %v404_v39 = vld [vmem:[%s3178_s17 + $0x150] sm:$0xff] }
  0x38   : > { %v1924_v0 = vadd.f32 %v1814_v47, %v1680_v38  ;;  %v5271_v5 = vrot.slane %v3410_v46, 1  ;;  %v2096_v9 = vrot.slane %v1984_v2, 2  ;;  %v535_v16 = vmul.f32 %v3216_v24, %v3246_v40  ;;  %454 = vst.msk [vmem:[#allocation2 + $0x150] sm:$0xff] %vm410_vm1, %v404_v39 }
  0x39   : > { %v5270_v14 = vrot.slane %v3422_v60, 2  ;;  %v604_v22 = vmul.f32 %v3218_v25, %v475_v54  ;;  %v1384_v52 = vadd.f32 %v1298_v56, %v1140_v3  ;;  %v849_v34 = vmul.f32 %v3220_v26, %v475_v54  ;;  %v405_v56 = vld [vmem:[%s3178_s17 + $0x158] sm:$0xff]  ;;  %v3450_v3 = vld [vmem:[#allocation2 + $0x40] sm:$0x3] }
  0x3a   : > { %v2168_v47 = vadd.f32 %v2058_v49, %v1924_v0  ;;  %v1854_v28 = vsel %vm698_vm3, %v1852_v4, %v5271_v5  ;;  %v1093_v40 = vmul.f32 %v3228_v30, %v3259_v45  ;;  %v1162_v49 = vmul.f32 %v3230_v31, %v3437_v29  ;;  %455 = vst.msk [vmem:[#allocation2 + $0x158] sm:$0xff] %vm410_vm1, %v405_v56 }
  0x3b   : > { %v2098_v38 = vsel %vm943_vm4, %v2096_v9, %v5270_v14  ;;  %v702_v19 = vrot.slane %v604_v22, 1  ;;  %v1628_v0 = vadd.f32 %v1542_v57, %v1384_v52  ;;  %v947_v4 = vrot.slane %v849_v34, 2 }
  0x3c   : > { %v2207_v2 = vadd.f32 %v3428_v7, %v2168_v47  ;;  %v1406_v54 = vmul.f32 %v3238_v35, %v3437_v29  ;;  %v1259_v22 = vrot.slane %v1162_v49, 1  ;;  %v1649_v14 = vmul.f32 %v3248_v41, %v3303_v6  ;;  %v499_v47 = vld [vmem:[#allocation2 + $0xd0] sm:$0x3] }
  0x3d   : > { %v703_v9 = vsel %vm698_vm3, %v700_v55, %v702_v19  ;;  %v1718_v57 = vmul.f32 %v3250_v42, %v3450_v3  ;;  %v1696_v34 = vadd.f32 %v1664_v17, %v1628_v0  ;;  %v948_v39 = vsel %vm943_vm4, %v945_v59, %v947_v4  ;;  %v382_v4 = vld [vmem:[%s3178_s17 + $0xa0] sm:$0x3] }
  0x3e   : > { %v2239_v52 = vmax.f32 %v2207_v2, 0.0  ;;  %v812_v5 = vadd.f32 %v703_v9, %v535_v16  ;;  %v1260_v48 = vsel %vm698_vm3, %v1257_v61, %v1259_v22  ;;  %v1503_v55 = vrot.slane %v1406_v54, 2  ;;  %432 = vst.msk [vmem:[#allocation2 + $0xa0] sm:$0x3] %vm413_vm2, %v382_v4 }
  0x3f   : > { %v1815_v19 = vrot.slane %v1718_v57, 1  ;;  %v1962_v49 = vmul.f32 %v3252_v43, %v3450_v3  ;;  %v1940_v56 = vadd.f32 %v1854_v28, %v1696_v34  ;;  %v551_v17 = vmul.f32 %v3216_v24, %v3312_v11 }
  0x40   : > { %2874 = vmatprep.mubr.msk.f32.mxu0 %vm410_vm1, %v2239_v52  ;;  %v1057_v36 = vadd.f32 %v948_v39, %v812_v5  ;;  %v628_v50 = vmul.f32 %v3218_v25, %v499_v47  ;;  %v1504_v53 = vsel %vm943_vm4, %v1501_v10, %v1503_v55  ;;  %v873_v16 = vmul.f32 %v3220_v26, %v499_v47  ;;  %v3482_v5 = vld [vmem:[#allocation2 + $0xe8] sm:$0x3] }
  0x41   : > { %v1816_v59 = vsel %vm698_vm3, %v1813_v21, %v1815_v19  ;;  %v2059_v61 = vrot.slane %v1962_v49, 2  ;;  %v2184_v2 = vadd.f32 %v2098_v38, %v1940_v56  ;;  %v1109_v11 = vmul.f32 %v3228_v30, %v3367_v63 }
  0x42   : > { %v1125_v28 = vadd.f32 %v1093_v40, %v1057_v36  ;;  %v742_v0 = vrot.slane %v628_v50, 1  ;;  %v987_v10 = vrot.slane %v873_v16, 2  ;;  %v1186_v12 = vmul.f32 %v3230_v31, %v3482_v5 }
  0x43   : > { %v2060_v62 = vsel %vm943_vm4, %v2057_v23, %v2059_v61  ;;  %v1430_v21 = vmul.f32 %v3238_v35, %v3482_v5  ;;  %v2223_v36 = vadd.f32 %v3428_v7, %v2184_v2  ;;  %v1665_v15 = vmul.f32 %v3248_v41, %v3399_v32  ;;  %v3501_v23 = vld [vmem:[#allocation2 + $0x100] sm:$0x3] }
  0x44   : > { %v1369_v38 = vadd.f32 %v1260_v48, %v1125_v28  ;;  %v743_v40 = vsel %vm698_vm3, %v740_v51, %v742_v0  ;;  %v988_v9 = vsel %vm943_vm4, %v985_v1, %v987_v10  ;;  %v1299_v22 = vrot.slane %v1186_v12, 1 }
  0x45   : > { %v828_v54 = vadd.f32 %v743_v40, %v551_v17  ;;  %v1543_v57 = vrot.slane %v1430_v21, 2  ;;  %v2255_v47 = vmax.f32 %v2223_v36, 0.0  ;;  %v1742_v27 = vmul.f32 %v3250_v42, %v3501_v23  ;;  %v406_v36 = vld [vmem:[%s3178_s17 + $0x160] sm:$0x3]  ;;  %v3557_v40 = vld [vmem:[#allocation2 + $0x48] sm:$0xff] }
  0x46   : > { %v1613_v52 = vadd.f32 %v1504_v53, %v1369_v38  ;;  %v1986_v51 = vmul.f32 %v3252_v43, %v3501_v23  ;;  %v1300_v39 = vsel %vm698_vm3, %v1297_v33, %v1299_v22  ;;  %v5299_v48 = vrot.slane %v3388_v13, 2  ;;  %456 = vst.msk [vmem:[#allocation2 + $0x160] sm:$0x3] %vm413_vm2, %v406_v36 }
  0x47   : > { %v1073_v34 = vadd.f32 %v988_v9, %v828_v54  ;;  %v536_v1 = vmul.f32 %v3216_v24, %v3257_v44  ;;  %2898 = vmatprep.mubr.msk.f32.mxu1 %vm410_vm1, %v2255_v47  ;;  %v1855_v19 = vrot.slane %v1742_v27, 1  ;;  %v605_v56 = vmul.f32 %v3218_v25, %v3257_v44 }
  0x48   : > { %v1544_v37 = vsel %vm943_vm4, %v5299_v48, %v1543_v57  ;;  %v1681_v55 = vadd.f32 %v1649_v14, %v1613_v52  ;;  %v2099_v49 = vrot.slane %v1986_v51, 2  ;;  %v3523_v8 = vmul.f32 %v3218_v25, %v3259_v45 }
  0x49   : > { %v1141_v17 = vadd.f32 %v1109_v11, %v1073_v34  ;;  %v850_v13 = vmul.f32 %v3220_v26, %v3257_v44  ;;  %v3529_v33 = vmul.f32 %v3220_v26, %v3259_v45  ;;  %v5300_v14 = vrot.slane %v3410_v46, 1  ;;  %v3567_v34 = vld [vmem:[#allocation2 + $0x50] sm:$0xff] }
  0x4a   : > { %v1925_v50 = vadd.f32 %v1816_v59, %v1681_v55  ;;  %v5301_v61 = vrot.slane %v3422_v60, 2  ;;  %v704_v2 = vrot.slane %v605_v56, 1  ;;  %v705_v0 = vrot.slane %v3523_v8, 1 }
  0x4b   : > { %v1856_v53 = vsel %vm698_vm3, %v5300_v14, %v1855_v19  ;;  %v1385_v28 = vadd.f32 %v1300_v39, %v1141_v17  ;;  %v949_v11 = vrot.slane %v850_v13, 2  ;;  %v950_v44 = vrot.slane %v3529_v33, 2 }
  0x4c   : > { %v2100_v16 = vsel %vm943_vm4, %v5301_v61, %v2099_v49  ;;  %v2169_v10 = vadd.f32 %v2060_v62, %v1925_v50  ;;  %v1094_v59 = vmul.f32 %v3228_v30, %v3283_v58  ;;  %v1163_v46 = vmul.f32 %v3230_v31, %v3283_v58 }
  0x4d   : > { %v3545_v12 = vmul.f32 %v3230_v31, %v3303_v6  ;;  %v1629_v60 = vadd.f32 %v1544_v37, %v1385_v28  ;;  %v706_v21 = vsel %vm698_vm3, %v704_v2, %v705_v0  ;;  %v951_v4 = vsel %vm943_vm4, %v949_v11, %v950_v44 }
  0x4e   : > { %v1407_v62 = vmul.f32 %v3238_v35, %v3283_v58  ;;  %v2208_v38 = vadd.f32 %v3428_v7, %v2169_v10  ;;  %v813_v54 = vadd.f32 %v706_v21, %v536_v1  ;;  %v1261_v9 = vrot.slane %v1163_v46, 1 }
  0x4f   : > { %v1262_v22 = vrot.slane %v3545_v12, 1  ;;  %v1697_v57 = vadd.f32 %v1665_v15, %v1629_v60  ;;  %v3563_v47 = vmul.f32 %v3238_v35, %v3303_v6  ;;  %v1650_v27 = vmul.f32 %v3248_v41, %v3557_v40 }
  0x50   : > { %v1505_v52 = vrot.slane %v1407_v62, 2  ;;  %v2240_v51 = vmax.f32 %v2208_v38, 0.0  ;;  %v1058_v39 = vadd.f32 %v951_v4, %v813_v54  ;;  %v1719_v37 = vmul.f32 %v3250_v42, %v3557_v40  ;;  %v383_v38 = vld [vmem:[%s3178_s17 + $0xa8] sm:$0xff]  ;;  %v384_v54 = vld [vmem:[%s3178_s17 + $0xb0] sm:$0xff] }
  0x51   : > { %v1263_v48 = vsel %vm698_vm3, %v1261_v9, %v1262_v22  ;;  %v1941_v15 = vadd.f32 %v1856_v53, %v1697_v57  ;;  %v1506_v1 = vrot.slane %v3563_v47, 2  ;;  %v3577_v55 = vmul.f32 %v3250_v42, %v3567_v34  ;;  %433 = vst.msk [vmem:[#allocation2 + $0xa8] sm:$0xff] %vm410_vm1, %v383_v38  ;;  %434 = vst.msk [vmem:[#allocation2 + $0xb0] sm:$0xff] %vm410_vm1, %v384_v54  ;;  %v3725_v47 = vld [vmem:[#allocation2 + $0x118] sm:$0x3] }
  0x52   : > { %v1963_v19 = vmul.f32 %v3252_v43, %v3557_v40  ;;  %2875 = vmatmul.mubr.msk.f32.vlgmr.msra.gmra.mrb[0].mxu0 %vm410_vm1, %v2240_v51  ;;  %v1126_v49 = vadd.f32 %v1094_v59, %v1058_v39  ;;  %v1817_v56 = vrot.slane %v1719_v37, 1  ;;  %v3584_v17 = vmul.f32 %v3252_v43, %v3567_v34 }
  0x53   : > { %v552_v13 = vmul.f32 %v3216_v24, %v3328_v18  ;;  %v2185_v50 = vadd.f32 %v2100_v16, %v1941_v15  ;;  %v1507_v14 = vsel %vm943_vm4, %v1505_v52, %v1506_v1  ;;  %v1818_v53 = vrot.slane %v3577_v55, 1  ;;  %v3630_v15 = vld [vmem:[#allocation2 + $0x108] sm:$0xff] }
  0x54   : > { %v2061_v61 = vrot.slane %v1963_v19, 2  ;;  %v1370_v2 = vadd.f32 %v1263_v48, %v1126_v49  ;;  %v2062_v28 = vrot.slane %v3584_v17, 2  ;;  %v629_v11 = vmul.f32 %v3218_v25, %v3328_v18 }
  0x55   : > { %v3597_v10 = vmul.f32 %v3218_v25, %v3367_v63  ;;  %v2224_v16 = vadd.f32 %v3428_v7, %v2185_v50  ;;  %v1819_v59 = vsel %vm698_vm3, %v1817_v56, %v1818_v53  ;;  %v874_v46 = vmul.f32 %v3220_v26, %v3328_v18 }
  0x56   : > { %v3607_v60 = vmul.f32 %v3220_v26, %v3367_v63  ;;  %v1614_v21 = vadd.f32 %v1507_v14, %v1370_v2  ;;  %v2063_v4 = vsel %vm943_vm4, %v2061_v61, %v2062_v28  ;;  %v744_v62 = vrot.slane %v629_v11, 1  ;;  %v3644_v2 = vld [vmem:[#allocation2 + $0x110] sm:$0xff] }
  0x57   : > { %v745_v36 = vrot.slane %v3597_v10, 1  ;;  %v2256_v9 = vmax.f32 %v2224_v16, 0.0  ;;  %v989_v57 = vrot.slane %v874_v46, 2  ;;  %v1110_v18 = vmul.f32 %v3228_v30, %v3393_v20 }
  0x58   : > { %v990_v52 = vrot.slane %v3607_v60, 2  ;;  %v1682_v51 = vadd.f32 %v1650_v27, %v1614_v21  ;;  %v1187_v48 = vmul.f32 %v3230_v31, %v3393_v20  ;;  %v3627_v37 = vmul.f32 %v3230_v31, %v3399_v32 }
  0x59   : > { %v746_v39 = vsel %vm698_vm3, %v744_v62, %v745_v36  ;;  %2899 = vmatmul.mubr.msk.f32.vlgmr.msra.gmra.mrb[0].mxu1 %vm410_vm1, %v2256_v9  ;;  %v1431_v49 = vmul.f32 %v3238_v35, %v3393_v20  ;;  %v3639_v56 = vmul.f32 %v3238_v35, %v3399_v32  ;;  %v1743_v21 = vmul.f32 %v3250_v42, %v3630_v15  ;;  %v407_v9 = vld [vmem:[%s3178_s17 + $0x168] sm:$0xff] }
  0x5a   : > { %v829_v19 = vadd.f32 %v746_v39, %v552_v13  ;;  %v991_v27 = vsel %vm943_vm4, %v989_v57, %v990_v52  ;;  %v1926_v50 = vadd.f32 %v1819_v59, %v1682_v51  ;;  %v1301_v14 = vrot.slane %v1187_v48, 1  ;;  %v408_v57 = vld [vmem:[%s3178_s17 + $0x170] sm:$0xff]  ;;  %457 = vst.msk [vmem:[#allocation2 + $0x168] sm:$0xff] %vm410_vm1, %v407_v9 }
  0x5b   : > { %v5276_v61 = vrot.slane %v3627_v37, 1  ;;  %v1666_v13 = vmul.f32 %v3248_v41, %v3630_v15  ;;  %v1545_v16 = vrot.slane %v1431_v49, 2  ;;  %v5275_v46 = vrot.slane %v3639_v56, 2  ;;  %458 = vst.msk [vmem:[#allocation2 + $0x170] sm:$0xff] %vm410_vm1, %v408_v57  ;;  %v3688_v57 = vld [vmem:[#allocation2 + $0x58] sm:$0x3] }
  0x5c   : > { %v1074_v11 = vadd.f32 %v991_v27, %v829_v19  ;;  %v2170_v62 = vadd.f32 %v2063_v4, %v1926_v50  ;;  %v3654_v38 = vmul.f32 %v3250_v42, %v3644_v2  ;;  %v1987_v54 = vmul.f32 %v3252_v43, %v3630_v15 }
  0x5d   : > { %v1303_v59 = vsel %vm698_vm3, %v1301_v14, %v5276_v61  ;;  %v1547_v39 = vsel %vm943_vm4, %v1545_v16, %v5275_v46  ;;  %v1857_v48 = vrot.slane %v1743_v21, 1  ;;  %v3665_v4 = vmul.f32 %v3252_v43, %v3644_v2 }
  0x5e   : > { %v1142_v51 = vadd.f32 %v1110_v18, %v1074_v11  ;;  %v2209_v19 = vadd.f32 %v3428_v7, %v2170_v62  ;;  %v5273_v27 = vrot.slane %v3654_v38, 1  ;;  %v2101_v49 = vrot.slane %v1987_v54, 2 }
  0x5f   : > { %v537_v18 = vmul.f32 %v3216_v24, %v3259_v45  ;;  %v5274_v14 = vrot.slane %v3665_v4, 2  ;;  %v607_v11 = vmul.f32 %v3218_v25, %v3437_v29  ;;  %v852_v16 = vmul.f32 %v3220_v26, %v3437_v29 }
  0x60   : > { %v1386_v50 = vadd.f32 %v1303_v59, %v1142_v51  ;;  %v2241_v21 = vmax.f32 %v2209_v19, 0.0  ;;  %v1859_v62 = vsel %vm698_vm3, %v1857_v48, %v5273_v27  ;;  %v1095_v54 = vmul.f32 %v3228_v30, %v3303_v6 }
  0x61   : > { %v1165_v45 = vmul.f32 %v3230_v31, %v3450_v3  ;;  %v2103_v9 = vsel %vm943_vm4, %v2101_v49, %v5274_v14  ;;  %v707_v51 = vrot.slane %v607_v11, 1  ;;  %v952_v29 = vrot.slane %v852_v16, 2 }
  0x62   : > { %v1630_v59 = vadd.f32 %v1547_v39, %v1386_v50  ;;  %2877 = vmatprep.mubr.msk.f32.mxu0 %vm410_vm1, %v2241_v21  ;;  %v1409_v48 = vmul.f32 %v3238_v35, %v3450_v3  ;;  %v1651_v27 = vmul.f32 %v3248_v41, %v3567_v34  ;;  %v1721_v39 = vmul.f32 %v3250_v42, %v3688_v57 }
  0x63   : > { %v1264_v19 = vrot.slane %v1165_v45, 1  ;;  %v708_v49 = vsel %vm698_vm3, %v705_v0, %v707_v51  ;;  %v953_v11 = vsel %vm943_vm4, %v950_v44, %v952_v29  ;;  %v1965_v16 = vmul.f32 %v3252_v43, %v3688_v57 }
  0x64   : > { %v1698_v50 = vadd.f32 %v1666_v13, %v1630_v59  ;;  %v814_v21 = vadd.f32 %v708_v49, %v537_v18  ;;  %v1508_v14 = vrot.slane %v1409_v48, 2  ;;  %v1820_v46 = vrot.slane %v1721_v39, 1 }
  0x65   : > { %v1265_v45 = vsel %vm698_vm3, %v1262_v22, %v1264_v19  ;;  %v2064_v13 = vrot.slane %v1965_v16, 2  ;;  %v553_v8 = vmul.f32 %v3216_v24, %v3367_v63  ;;  %v631_v33 = vmul.f32 %v3218_v25, %v3482_v5 }
  0x66   : > { %v1942_v61 = vadd.f32 %v1859_v62, %v1698_v50  ;;  %v1059_v0 = vadd.f32 %v953_v11, %v814_v21  ;;  %v1509_v44 = vsel %vm943_vm4, %v1506_v1, %v1508_v14  ;;  %v1821_v12 = vsel %vm698_vm3, %v1818_v53, %v1820_v46 }
  0x67   : > { %v876_v22 = vmul.f32 %v3220_v26, %v3482_v5  ;;  %v2065_v63 = vsel %vm943_vm4, %v2062_v28, %v2064_v13  ;;  %v747_v62 = vrot.slane %v631_v33, 1  ;;  %v1111_v59 = vmul.f32 %v3228_v30, %v3399_v32  ;;  %v385_v5 = vld [vmem:[%s3178_s17 + $0xb8] sm:$0x3] }
  0x68   : > { %v2186_v18 = vadd.f32 %v2103_v9, %v1942_v61  ;;  %v1127_v51 = vadd.f32 %v1095_v54, %v1059_v0  ;;  %v1189_v55 = vmul.f32 %v3230_v31, %v3501_v23  ;;  %v1433_v53 = vmul.f32 %v3238_v35, %v3501_v23  ;;  %435 = vst.msk [vmem:[#allocation2 + $0xb8] sm:$0x3] %vm413_vm2, %v385_v5 }
  0x69   : > { %v992_v1 = vrot.slane %v876_v22, 2  ;;  %v748_v17 = vsel %vm698_vm3, %v745_v36, %v747_v62  ;;  %v1667_v28 = vmul.f32 %v3248_v41, %v3644_v2  ;;  %v1745_v46 = vmul.f32 %v3250_v42, %v3725_v47 }
  0x6a   : > { %v2225_v61 = vadd.f32 %v3428_v7, %v2186_v18  ;;  %v1371_v14 = vadd.f32 %v1265_v45, %v1127_v51  ;;  %v830_v54 = vadd.f32 %v748_v17, %v553_v8  ;;  %v1304_v29 = vrot.slane %v1189_v55, 1 }
  0x6b   : > { %v993_v9 = vsel %vm943_vm4, %v990_v52, %v992_v1  ;;  %v1548_v48 = vrot.slane %v1433_v53, 2  ;;  %v1860_v10 = vrot.slane %v1745_v46, 1  ;;  %v1989_v36 = vmul.f32 %v3252_v43, %v3725_v47  ;;  %v409_v46 = vld [vmem:[%s3178_s17 + $0x178] sm:$0x3]  ;;  %s3902_s17 = scalar_lea.vmem %s5264_s1, %s2837_s12  ;;  %s2685_s12 = sshll.u32 %s5135_s8, 4  ;;  %s5211_s12 = int_to_ptr.vmem [resolvable:$true] %s2685_s12 }
  0x6c   : > { %v2257_v19 = vmax.f32 %v2225_v61, 0.0  ;;  %v1615_v39 = vadd.f32 %v1509_v44, %v1371_v14  ;;  %v1075_v50 = vadd.f32 %v993_v9, %v830_v54  ;;  %v5302_v49 = vrot.slane %v3627_v37, 1  ;;  %459 = vst.msk [vmem:[#allocation2 + $0x178] sm:$0x3] %vm413_vm2, %v409_v46  ;;  %s2992_s13 = scalar_lea.vmem %s5211_s12, 4096  ;;  %p2999_p1 = scmp.lt.s32.totalorder %s5211_s12, %s2997_s18 }
  0x6d   : > { %v538_v16 = vmul.f32 %v3216_v24, %v3283_v58  ;;  %v5303_v60 = vrot.slane %v3639_v56, 2  ;;  %v5304_v21 = vrot.slane %v3654_v38, 1  ;;  %v2104_v13 = vrot.slane %v1989_v36, 2  ;;  %p2993_p12 = scmp.ne.s32.totalorder %s5211_s12, %s2992_s13  ;;  %p3000_p2 = scmp.lt.s32.totalorder %s2998_s19, %s2992_s13 }
  0x6e   : > { %v1305_v11 = vsel %vm698_vm3, %v5302_v49, %v1304_v29  ;;  %2901 = vmatprep.mubr.msk.f32.mxu1 %vm410_vm1, %v2257_v19  ;;  %v608_v8 = vmul.f32 %v3218_v25, %v3283_v58  ;;  %v1683_v37 = vadd.f32 %v1651_v27, %v1615_v39  ;;  %v1143_v33 = vadd.f32 %v1111_v59, %v1075_v50  ;;  %v3802_v39 = vld [vmem:[#allocation2 + $0x68] sm:$0xff] }
  0x6f   : > { %v1549_v52 = vsel %vm943_vm4, %v5303_v60, %v1548_v48  ;;  %v1861_v45 = vsel %vm698_vm3, %v5304_v21, %v1860_v10  ;;  %v3762_v0 = vmul.f32 %v3218_v25, %v3303_v6  ;;  %v853_v44 = vmul.f32 %v3220_v26, %v3283_v58  ;;  %v3799_v48 = vld [vmem:[#allocation2 + $0x60] sm:$0xff]  ;;  %p2994_p13 = pnand %p2993_p12, %p3150_p4  ;;  %p3001_p3 = por %p3000_p2, %p2999_p1 }
  0x70   : > { %v5305_v56 = vrot.slane %v3665_v4, 2  ;;  %v709_v38 = vrot.slane %v608_v8, 1  ;;  %v3771_v18 = vmul.f32 %v3220_v26, %v3303_v6  ;;  %v1096_v27 = vmul.f32 %v3228_v30, %v3557_v40 }
  0x71   : > { %v1927_v62 = vadd.f32 %v1821_v12, %v1683_v37  ;;  %v1387_v59 = vadd.f32 %v1305_v11, %v1143_v33  ;;  %v710_v51 = vrot.slane %v3762_v0, 1  ;;  %v954_v1 = vrot.slane %v853_v44, 2  ;;  %p2995_p0 = pneg %p2994_p13 }
  0x72   : > { %v2105_v22 = vsel %vm943_vm4, %v5305_v56, %v2104_v13  ;;  %v955_v58 = vrot.slane %v3771_v18, 2  ;;  %v1166_v4 = vmul.f32 %v3230_v31, %v3557_v40  ;;  %v3781_v55 = vmul.f32 %v3230_v31, %v3567_v34 }
  0x73   : > { %v1410_v53 = vmul.f32 %v3238_v35, %v3557_v40  ;;  %v2171_v5 = vadd.f32 %v2065_v63, %v1927_v62  ;;  %v1631_v61 = vadd.f32 %v1549_v52, %v1387_v59  ;;  %v711_v12 = vsel %vm698_vm3, %v709_v38, %v710_v51  ;;  %p3002_p5 = pnand %p3001_p3, %p2995_p0 }
  0x74   : > { %v3790_v17 = vmul.f32 %v3238_v35, %v3567_v34  ;;  %v815_v14 = vadd.f32 %v711_v12, %v538_v16  ;;  %v956_v54 = vsel %vm943_vm4, %v954_v1, %v955_v58  ;;  %v1266_v9 = vrot.slane %v1166_v4, 1 }
  0x75   : > { %v1267_v29 = vrot.slane %v3781_v55, 1  ;;  %v2210_v63 = vadd.f32 %v3428_v7, %v2171_v5  ;;  %v1699_v19 = vadd.f32 %v1667_v28, %v1631_v61  ;;  %v1510_v10 = vrot.slane %v1410_v53, 2 }
  0x76   : > { %v1511_v36 = vrot.slane %v3790_v17, 2  ;;  %v1060_v50 = vadd.f32 %v956_v54, %v815_v14  ;;  %v1652_v11 = vmul.f32 %v3248_v41, %v3799_v48  ;;  %v1722_v16 = vmul.f32 %v3250_v42, %v3799_v48  ;;  %v3964_v17 = vld [vmem:[#allocation2 + $0x130] sm:$0x3] }
  0x77   : > { %v1268_v49 = vsel %vm698_vm3, %v1266_v9, %v1267_v29  ;;  %v2242_v60 = vmax.f32 %v2210_v63, 0.0  ;;  %v1943_v28 = vadd.f32 %v1861_v45, %v1699_v19  ;;  %v3816_v21 = vmul.f32 %v3250_v42, %v3802_v39 }
  0x78   : > { %v1512_v52 = vsel %vm943_vm4, %v1510_v10, %v1511_v36  ;;  %v1128_v13 = vadd.f32 %v1096_v27, %v1060_v50  ;;  %v1822_v8 = vrot.slane %v1722_v16, 1  ;;  %v1966_v37 = vmul.f32 %v3252_v43, %v3799_v48  ;;  %v3862_v16 = vld [vmem:[#allocation2 + $0x120] sm:$0xff] }
  0x79   : > { %v3822_v33 = vmul.f32 %v3252_v43, %v3802_v39  ;;  %2878 = vmatmul.mubr.msk.f32.gmra.mrb[2].mxu0 %vm410_vm1, %v2242_v60  ;;  %v2187_v45 = vadd.f32 %v2105_v22, %v1943_v28  ;;  %v1823_v44 = vrot.slane %v3816_v21, 1  ;;  %v554_v56 = vmul.f32 %v3216_v24, %v3393_v20 }
  0x7a   : > { %v632_v38 = vmul.f32 %v3218_v25, %v3393_v20  ;;  %v1372_v27 = vadd.f32 %v1268_v49, %v1128_v13  ;;  %v2066_v62 = vrot.slane %v1966_v37, 2  ;;  %v3833_v1 = vmul.f32 %v3218_v25, %v3399_v32 }
  0x7b   : > { %v2067_v59 = vrot.slane %v3822_v33, 2  ;;  %v2226_v4 = vadd.f32 %v3428_v7, %v2187_v45  ;;  %v1824_v22 = vsel %vm698_vm3, %v1822_v8, %v1823_v44  ;;  %v877_v5 = vmul.f32 %v3220_v26, %v3393_v20 }
  0x7c   : > { %v749_v53 = vrot.slane %v632_v38, 1  ;;  %v1616_v61 = vadd.f32 %v1512_v52, %v1372_v27  ;;  %v750_v46 = vrot.slane %v3833_v1, 1  ;;  %v3847_v14 = vmul.f32 %v3220_v26, %v3399_v32 }
  0x7d   : > { %v2068_v12 = vsel %vm943_vm4, %v2066_v62, %v2067_v59  ;;  %v2258_v54 = vmax.f32 %v2226_v4, 0.0  ;;  %v994_v9 = vrot.slane %v877_v5, 2  ;;  %v1112_v63 = vmul.f32 %v3228_v30, %v3630_v15 }
  0x7e   : > { %v1190_v19 = vmul.f32 %v3230_v31, %v3630_v15  ;;  %v1684_v20 = vadd.f32 %v1652_v11, %v1616_v61  ;;  %v751_v10 = vsel %vm698_vm3, %v749_v53, %v750_v46  ;;  %v995_v50 = vrot.slane %v3847_v14, 2 }
  0x7f   : > { %v3859_v49 = vmul.f32 %v3230_v31, %v3644_v2  ;;  %2902 = vmatmul.mubr.msk.f32.gmra.mrb[2].mxu1 %vm410_vm1, %v2258_v54  ;;  %v831_v60 = vadd.f32 %v751_v10, %v554_v56  ;;  %v1434_v11 = vmul.f32 %v3238_v35, %v3630_v15  ;;  %v3868_v52 = vmul.f32 %v3238_v35, %v3644_v2  ;;  %v3876_v56 = vld [vmem:[#allocation2 + $0x128] sm:$0xff] }
  0x80   : > { %v1306_v28 = vrot.slane %v1190_v19, 1  ;;  %v1928_v13 = vadd.f32 %v1824_v22, %v1684_v20  ;;  %v996_v8 = vsel %vm943_vm4, %v994_v9, %v995_v50  ;;  %v1668_v45 = vmul.f32 %v3248_v41, %v3862_v16 }
  0x81   : > { %v5280_v37 = vrot.slane %v3859_v49, 1  ;;  %v1076_v38 = vadd.f32 %v996_v8, %v831_v60  ;;  %v1550_v27 = vrot.slane %v1434_v11, 2  ;;  %v5279_v62 = vrot.slane %v3868_v52, 2  ;;  %v461_v11 = vld [vmem:[%s3902_s17 + $0x8] sm:$0xff] }
  0x82   : > { %v1746_v4 = vmul.f32 %v3250_v42, %v3862_v16  ;;  %v2172_v53 = vadd.f32 %v2068_v12, %v1928_v13  ;;  %v3886_v5 = vmul.f32 %v3250_v42, %v3876_v56  ;;  %v1990_v61 = vmul.f32 %v3252_v43, %v3862_v16  ;;  %468 = vst.msk [vmem:[#allocation2 + $0x188] sm:$0xff] %vm410_vm1, %v461_v11 }
  0x83   : > { %v1308_v22 = vsel %vm698_vm3, %v1306_v28, %v5280_v37  ;;  %v1144_v54 = vadd.f32 %v1112_v63, %v1076_v38  ;;  %v1552_v9 = vsel %vm943_vm4, %v1550_v27, %v5279_v62  ;;  %v3897_v12 = vmul.f32 %v3252_v43, %v3876_v56  ;;  %v460_v28 = vld [vmem:[%s3902_s17] sm:$0xff] }
  0x84   : > { %v1862_v19 = vrot.slane %v1746_v4, 1  ;;  %v2211_v20 = vadd.f32 %v3428_v7, %v2172_v53  ;;  %v5277_v63 = vrot.slane %v3886_v5, 1  ;;  %v2106_v10 = vrot.slane %v1990_v61, 2  ;;  %467 = vst.msk [vmem:[#allocation2 + $0x180] sm:$0xff] %vm410_vm1, %v460_v28 }
  0x85   : > { %v539_v60 = vmul.f32 %v3216_v24, %v3303_v6  ;;  %v1388_v13 = vadd.f32 %v1308_v22, %v1144_v54  ;;  %v5278_v8 = vrot.slane %v3897_v12, 2  ;;  %v610_v38 = vmul.f32 %v3218_v25, %v3450_v3  ;;  %v3927_v54 = vld [vmem:[#allocation2 + $0x70] sm:$0x3] }
  0x86   : > { %v855_v27 = vmul.f32 %v3220_v26, %v3450_v3  ;;  %v2243_v4 = vmax.f32 %v2211_v20, 0.0  ;;  %v1864_v6 = vsel %vm698_vm3, %v1862_v19, %v5277_v63  ;;  %v1097_v53 = vmul.f32 %v3228_v30, %v3567_v34 }
  0x87   : > { %v1168_v22 = vmul.f32 %v3230_v31, %v3688_v57  ;;  %v1632_v61 = vadd.f32 %v1552_v9, %v1388_v13  ;;  %v2108_v3 = vsel %vm943_vm4, %v2106_v10, %v5278_v8  ;;  %v712_v28 = vrot.slane %v610_v38, 1 }
  0x88   : > { %v957_v11 = vrot.slane %v855_v27, 2  ;;  %2880 = vmatprep.mubr.msk.f32.mxu0 %vm410_vm1, %v2243_v4  ;;  %v1412_v19 = vmul.f32 %v3238_v35, %v3688_v57  ;;  %v1653_v63 = vmul.f32 %v3248_v41, %v3802_v39  ;;  %v1724_v9 = vmul.f32 %v3250_v42, %v3927_v54 }
  0x89   : > { %v1269_v20 = vrot.slane %v1168_v22, 1  ;;  %v1700_v13 = vadd.f32 %v1668_v45, %v1632_v61  ;;  %v713_v10 = vsel %vm698_vm3, %v710_v51, %v712_v28  ;;  %v1968_v27 = vmul.f32 %v3252_v43, %v3927_v54 }
  0x8a   : > { %v958_v38 = vsel %vm943_vm4, %v955_v58, %v957_v11  ;;  %v816_v4 = vadd.f32 %v713_v10, %v539_v60  ;;  %v1513_v8 = vrot.slane %v1412_v19, 2  ;;  %v1825_v62 = vrot.slane %v1724_v9, 1 }
  0x8b   : > { %v1270_v22 = vsel %vm698_vm3, %v1267_v29, %v1269_v20  ;;  %v1944_v37 = vadd.f32 %v1864_v6, %v1700_v13  ;;  %v2069_v45 = vrot.slane %v1968_v27, 2  ;;  %v555_v0 = vmul.f32 %v3216_v24, %v3399_v32 }
  0x8c   : > { %v634_v18 = vmul.f32 %v3218_v25, %v3501_v23  ;;  %v1061_v51 = vadd.f32 %v958_v38, %v816_v4  ;;  %v1514_v58 = vsel %vm943_vm4, %v1511_v36, %v1513_v8  ;;  %v1826_v55 = vsel %vm698_vm3, %v1823_v44, %v1825_v62 }
  0x8d   : > { %v879_v29 = vmul.f32 %v3220_v26, %v3501_v23  ;;  %v2188_v60 = vadd.f32 %v2108_v3, %v1944_v37  ;;  %v2070_v32 = vsel %vm943_vm4, %v2067_v59, %v2069_v45  ;;  %v1113_v61 = vmul.f32 %v3228_v30, %v3644_v2 }
  0x8e   : > { %v752_v6 = vrot.slane %v634_v18, 1  ;;  %v1129_v28 = vadd.f32 %v1097_v53, %v1061_v51  ;;  %v1192_v21 = vmul.f32 %v3230_v31, %v3725_v47  ;;  %v1436_v44 = vmul.f32 %v3238_v35, %v3725_v47 }
  0x8f   : > { %v997_v36 = vrot.slane %v879_v29, 2  ;;  %v2227_v23 = vadd.f32 %v3428_v7, %v2188_v60  ;;  %v1669_v59 = vmul.f32 %v3248_v41, %v3876_v56  ;;  %v1748_v37 = vmul.f32 %v3250_v42, %v3964_v17 }
  0x90   : > { %v753_v33 = vsel %vm698_vm3, %v750_v46, %v752_v6  ;;  %v1373_v62 = vadd.f32 %v1270_v22, %v1129_v28  ;;  %v1309_v3 = vrot.slane %v1192_v21, 1  ;;  %v1553_v20 = vrot.slane %v1436_v44, 2 }
  0x91   : > { %v832_v8 = vadd.f32 %v753_v33, %v555_v0  ;;  %v998_v53 = vsel %vm943_vm4, %v995_v50, %v997_v36  ;;  %v2259_v11 = vmax.f32 %v2227_v23, 0.0  ;;  %v1865_v19 = vrot.slane %v1748_v37, 1 }
  0x92   : > { %v1992_v1 = vmul.f32 %v3252_v43, %v3964_v17  ;;  %v1617_v46 = vadd.f32 %v1514_v58, %v1373_v62  ;;  %v5306_v13 = vrot.slane %v3859_v49, 1  ;;  %v540_v38 = vmul.f32 %v3216_v24, %v3557_v40 }
  0x93   : > { %v1077_v9 = vadd.f32 %v998_v53, %v832_v8  ;;  %2904 = vmatprep.mubr.msk.f32.mxu1 %vm410_vm1, %v2259_v11  ;;  %v5307_v14 = vrot.slane %v3868_v52, 2  ;;  %v5308_v27 = vrot.slane %v3886_v5, 1  ;;  %v611_v45 = vmul.f32 %v3218_v25, %v3557_v40  ;;  %v4034_v11 = vld [vmem:[#allocation2 + $0x78] sm:$0xff] }
  0x94   : > { %v1310_v10 = vsel %vm698_vm3, %v5306_v13, %v1309_v3  ;;  %v2109_v22 = vrot.slane %v1992_v1, 2  ;;  %v1685_v49 = vadd.f32 %v1653_v63, %v1617_v46  ;;  %v3999_v18 = vmul.f32 %v3218_v25, %v3567_v34  ;;  %v462_v1 = vld [vmem:[%s3902_s17 + $0x10] sm:$0x3]  ;;  %v4038_v46 = vld [vmem:[#allocation2 + $0x80] sm:$0xff] }
  0x95   : > { %v1554_v50 = vsel %vm943_vm4, %v5307_v14, %v1553_v20  ;;  %v1866_v4 = vsel %vm698_vm3, %v5308_v27, %v1865_v19  ;;  %v1145_v0 = vadd.f32 %v1113_v61, %v1077_v9  ;;  %v856_v51 = vmul.f32 %v3220_v26, %v3557_v40  ;;  %469 = vst.msk [vmem:[#allocation2 + $0x190] sm:$0x3] %vm413_vm2, %v462_v1 }
  0x96   : > { %v5309_v52 = vrot.slane %v3897_v12, 2  ;;  %v714_v5 = vrot.slane %v611_v45, 1  ;;  %v4008_v29 = vmul.f32 %v3220_v26, %v3567_v34  ;;  %v1098_v63 = vmul.f32 %v3228_v30, %v3799_v48 }
  0x97   : > { %v1929_v60 = vadd.f32 %v1826_v55, %v1685_v49  ;;  %v1389_v6 = vadd.f32 %v1310_v10, %v1145_v0  ;;  %v715_v61 = vrot.slane %v3999_v18, 1  ;;  %v959_v28 = vrot.slane %v856_v51, 2 }
  0x98   : > { %v2110_v58 = vsel %vm943_vm4, %v5309_v52, %v2109_v22  ;;  %v960_v36 = vrot.slane %v4008_v29, 2  ;;  %v1169_v40 = vmul.f32 %v3230_v31, %v3799_v48  ;;  %v4018_v12 = vmul.f32 %v3230_v31, %v3802_v39 }
  0x99   : > { %v1413_v21 = vmul.f32 %v3238_v35, %v3799_v48  ;;  %v2173_v44 = vadd.f32 %v2070_v32, %v1929_v60  ;;  %v1633_v23 = vadd.f32 %v1554_v50, %v1389_v6  ;;  %v716_v55 = vsel %vm698_vm3, %v714_v5, %v715_v61 }
  0x9a   : > { %v4027_v33 = vmul.f32 %v3238_v35, %v3802_v39  ;;  %v817_v37 = vadd.f32 %v716_v55, %v540_v38  ;;  %v961_v62 = vsel %vm943_vm4, %v959_v28, %v960_v36  ;;  %v1271_v8 = vrot.slane %v1169_v40, 1 }
  0x9b   : > { %v1272_v53 = vrot.slane %v4018_v12, 1  ;;  %v2212_v3 = vadd.f32 %v3428_v7, %v2173_v44  ;;  %v1701_v32 = vadd.f32 %v1669_v59, %v1633_v23  ;;  %v1515_v20 = vrot.slane %v1413_v21, 2 }
  0x9c   : > { %v1516_v19 = vrot.slane %v4027_v33, 2  ;;  %v1062_v9 = vadd.f32 %v961_v62, %v817_v37  ;;  %v1654_v10 = vmul.f32 %v3248_v41, %v4034_v11  ;;  %v1725_v38 = vmul.f32 %v3250_v42, %v4034_v11  ;;  %v4194_v33 = vld [vmem:[#allocation2 + $0x148] sm:$0x3] }
  0x9d   : > { %v1273_v13 = vsel %vm698_vm3, %v1271_v8, %v1272_v53  ;;  %v2244_v59 = vmax.f32 %v2212_v3, 0.0  ;;  %v1945_v14 = vadd.f32 %v1866_v4, %v1701_v32  ;;  %v4053_v27 = vmul.f32 %v3250_v42, %v4038_v46 }
  0x9e   : > { %v1517_v50 = vsel %vm943_vm4, %v1515_v20, %v1516_v19  ;;  %v1130_v22 = vadd.f32 %v1098_v63, %v1062_v9  ;;  %v1827_v45 = vrot.slane %v1725_v38, 1  ;;  %v1969_v49 = vmul.f32 %v3252_v43, %v4034_v11  ;;  %v4099_v38 = vld [vmem:[#allocation2 + $0x138] sm:$0xff] }
  0x9f   : > { %v4059_v0 = vmul.f32 %v3252_v43, %v4038_v46  ;;  %2881 = vmatmul.mubr.msk.f32.gmra.mrb[4].mxu0 %vm410_vm1, %v2244_v59  ;;  %v2189_v4 = vadd.f32 %v2110_v58, %v1945_v14  ;;  %v1828_v51 = vrot.slane %v4053_v27, 1  ;;  %v556_v52 = vmul.f32 %v3216_v24, %v3630_v15 }
  0xa0   : > { %v635_v5 = vmul.f32 %v3218_v25, %v3630_v15  ;;  %v1374_v63 = vadd.f32 %v1273_v13, %v1130_v22  ;;  %v2071_v60 = vrot.slane %v1969_v49, 2  ;;  %v4070_v28 = vmul.f32 %v3218_v25, %v3644_v2 }
  0xa1   : > { %v2072_v6 = vrot.slane %v4059_v0, 2  ;;  %v2228_v40 = vadd.f32 %v3428_v7, %v2189_v4  ;;  %v1829_v58 = vsel %vm698_vm3, %v1827_v45, %v1828_v51  ;;  %v880_v44 = vmul.f32 %v3220_v26, %v3630_v15 }
  0xa2   : > { %v754_v21 = vrot.slane %v635_v5, 1  ;;  %v1618_v23 = vadd.f32 %v1517_v50, %v1374_v63  ;;  %v755_v37 = vrot.slane %v4070_v28, 1  ;;  %v4084_v62 = vmul.f32 %v3220_v26, %v3644_v2  ;;  %v4113_v5 = vld [vmem:[#allocation2 + $0x140] sm:$0xff] }
  0xa3   : > { %v2073_v55 = vsel %vm943_vm4, %v2071_v60, %v2072_v6  ;;  %v2260_v8 = vmax.f32 %v2228_v40, 0.0  ;;  %v999_v3 = vrot.slane %v880_v44, 2  ;;  %v1114_v32 = vmul.f32 %v3228_v30, %v3862_v16 }
  0xa4   : > { %v1193_v20 = vmul.f32 %v3230_v31, %v3862_v16  ;;  %v1686_v15 = vadd.f32 %v1654_v10, %v1618_v23  ;;  %v756_v1 = vsel %vm698_vm3, %v754_v21, %v755_v37  ;;  %v1000_v9 = vrot.slane %v4084_v62, 2 }
  0xa5   : > { %v4096_v13 = vmul.f32 %v3230_v31, %v3876_v56  ;;  %2905 = vmatmul.mubr.msk.f32.gmra.mrb[4].mxu1 %vm410_vm1, %v2260_v8  ;;  %v833_v59 = vadd.f32 %v756_v1, %v556_v52  ;;  %v1437_v50 = vmul.f32 %v3238_v35, %v3862_v16  ;;  %v4105_v10 = vmul.f32 %v3238_v35, %v3876_v56 }
  0xa6   : > { %v1311_v14 = vrot.slane %v1193_v20, 1  ;;  %v1930_v22 = vadd.f32 %v1829_v58, %v1686_v15  ;;  %v1001_v45 = vsel %vm943_vm4, %v999_v3, %v1000_v9  ;;  %v1670_v4 = vmul.f32 %v3248_v41, %v4099_v38 }
  0xa7   : > { %v1312_v49 = vrot.slane %v4096_v13, 1  ;;  %v1078_v52 = vadd.f32 %v1001_v45, %v833_v59  ;;  %v1555_v63 = vrot.slane %v1437_v50, 2  ;;  %v5283_v60 = vrot.slane %v4105_v10, 2 }
  0xa8   : > { %v1749_v40 = vmul.f32 %v3250_v42, %v4099_v38  ;;  %v2174_v21 = vadd.f32 %v2073_v55, %v1930_v22  ;;  %v4123_v44 = vmul.f32 %v3250_v42, %v4113_v5  ;;  %v1993_v23 = vmul.f32 %v3252_v43, %v4099_v38 }
  0xa9   : > { %v1313_v58 = vsel %vm698_vm3, %v1311_v14, %v1312_v49  ;;  %v1146_v8 = vadd.f32 %v1114_v32, %v1078_v52  ;;  %v1557_v3 = vsel %vm943_vm4, %v1555_v63, %v5283_v60  ;;  %v4132_v55 = vmul.f32 %v3252_v43, %v4113_v5 }
  0xaa   : > { %v1867_v20 = vrot.slane %v1749_v40, 1  ;;  %v2213_v15 = vadd.f32 %v3428_v7, %v2174_v21  ;;  %v5281_v1 = vrot.slane %v4123_v44, 1  ;;  %v2111_v59 = vrot.slane %v1993_v23, 2  ;;  %v463_v40 = vld [vmem:[%s3902_s17 + $0x18] sm:$0xff]  ;;  %v464_v21 = vld [vmem:[%s3902_s17 + $0x20] sm:$0xff] }
  0xab   : > { %v541_v14 = vmul.f32 %v3216_v24, %v3567_v34  ;;  %v1390_v32 = vadd.f32 %v1313_v58, %v1146_v8  ;;  %v5282_v50 = vrot.slane %v4132_v55, 2  ;;  %v613_v22 = vmul.f32 %v3218_v25, %v3688_v57  ;;  %v4155_v8 = vld [vmem:[#allocation2 + $0x88] sm:$0x3]  ;;  %470 = vst.msk [vmem:[#allocation2 + $0x198] sm:$0xff] %vm410_vm1, %v463_v40  ;;  %471 = vst.msk [vmem:[#allocation2 + $0x1a0] sm:$0xff] %vm410_vm1, %v464_v21 }
  0xac   : > { %v858_v45 = vmul.f32 %v3220_v26, %v3688_v57  ;;  %v2245_v52 = vmax.f32 %v2213_v15, 0.0  ;;  %v1869_v7 = vsel %vm698_vm3, %v1867_v20, %v5281_v1  ;;  %v1099_v63 = vmul.f32 %v3228_v30, %v3802_v39 }
  0xad   : > { %v1171_v34 = vmul.f32 %v3230_v31, %v3927_v54  ;;  %v1634_v58 = vadd.f32 %v1557_v3, %v1390_v32  ;;  %v2113_v23 = vsel %vm943_vm4, %v2111_v59, %v5282_v50  ;;  %v717_v57 = vrot.slane %v613_v22, 1 }
  0xae   : > { %v962_v15 = vrot.slane %v858_v45, 2  ;;  %2883 = vmatprep.mubr.msk.f32.mxu0 %vm410_vm1, %v2245_v52  ;;  %v1415_v1 = vmul.f32 %v3238_v35, %v3927_v54  ;;  %v1655_v3 = vmul.f32 %v3248_v41, %v4038_v46  ;;  %v1727_v59 = vmul.f32 %v3250_v42, %v4155_v8 }
  0xaf   : > { %v1274_v20 = vrot.slane %v1171_v34, 1  ;;  %v1702_v32 = vadd.f32 %v1670_v4, %v1634_v58  ;;  %v718_v22 = vsel %vm698_vm3, %v715_v61, %v717_v57  ;;  %v1971_v52 = vmul.f32 %v3252_v43, %v4155_v8 }
  0xb0   : > { %v963_v45 = vsel %vm943_vm4, %v960_v36, %v962_v15  ;;  %v818_v34 = vadd.f32 %v718_v22, %v541_v14  ;;  %v1518_v21 = vrot.slane %v1415_v1, 2  ;;  %v1830_v50 = vrot.slane %v1727_v59, 1 }
  0xb1   : > { %v1275_v40 = vsel %vm698_vm3, %v1272_v53, %v1274_v20  ;;  %v1946_v60 = vadd.f32 %v1869_v7, %v1702_v32  ;;  %v2074_v4 = vrot.slane %v1971_v52, 2  ;;  %v557_v18 = vmul.f32 %v3216_v24, %v3644_v2 }
  0xb2   : > { %v637_v29 = vmul.f32 %v3218_v25, %v3725_v47  ;;  %v1063_v61 = vadd.f32 %v963_v45, %v818_v34  ;;  %v1519_v36 = vsel %vm943_vm4, %v1516_v19, %v1518_v21  ;;  %v1831_v12 = vsel %vm698_vm3, %v1828_v51, %v1830_v50 }
  0xb3   : > { %v882_v53 = vmul.f32 %v3220_v26, %v3725_v47  ;;  %v2190_v1 = vadd.f32 %v2113_v23, %v1946_v60  ;;  %v2075_v2 = vsel %vm943_vm4, %v2072_v6, %v2074_v4  ;;  %v1115_v7 = vmul.f32 %v3228_v30, %v3876_v56  ;;  %v4203_v47 = vld [vmem:[%s5266_s3] ss:$0 sm:$0xff] }
  0xb4   : > { %v757_v14 = vrot.slane %v637_v29, 1  ;;  %v1131_v58 = vadd.f32 %v1099_v63, %v1063_v61  ;;  %v1195_v27 = vmul.f32 %v3230_v31, %v3964_v17  ;;  %v1439_v51 = vmul.f32 %v3238_v35, %v3964_v17 }
  0xb5   : > { %v1002_v19 = vrot.slane %v882_v53, 2  ;;  %v2229_v0 = vadd.f32 %v4203_v47, %v2190_v1  ;;  %v1671_v60 = vmul.f32 %v3248_v41, %v4113_v5  ;;  %v1751_v50 = vmul.f32 %v3250_v42, %v4194_v33 }
  0xb6   : > { %v758_v6 = vsel %vm698_vm3, %v755_v37, %v757_v14  ;;  %v1375_v63 = vadd.f32 %v1275_v40, %v1131_v58  ;;  %v1314_v15 = vrot.slane %v1195_v27, 1  ;;  %v1558_v59 = vrot.slane %v1439_v51, 2 }
  0xb7   : > { %v834_v23 = vadd.f32 %v758_v6, %v557_v18  ;;  %v1003_v57 = vsel %vm943_vm4, %v1000_v9, %v1002_v19  ;;  %v2261_v20 = vmax.f32 %v2229_v0, 0.0  ;;  %v1870_v32 = vrot.slane %v1751_v50, 1 }
  0xb8   : > { %v1995_v28 = vmul.f32 %v3252_v43, %v4194_v33  ;;  %v1619_v37 = vadd.f32 %v1519_v36, %v1375_v63  ;;  %v1315_v45 = vsel %vm698_vm3, %v1312_v49, %v1314_v15  ;;  %v542_v52 = vmul.f32 %v3216_v24, %v3799_v48  ;;  %v4269_v15 = vld [vmem:[#allocation2 + $0x90] sm:$0xff] }
  0xb9   : > { %v1079_v22 = vadd.f32 %v1003_v57, %v834_v23  ;;  %2907 = vmatprep.mubr.msk.f32.mxu1 %vm410_vm1, %v2261_v20  ;;  %v5310_v62 = vrot.slane %v4105_v10, 2  ;;  %v5311_v34 = vrot.slane %v4123_v44, 1  ;;  %v614_v4 = vmul.f32 %v3218_v25, %v3799_v48 }
  0xba   : > { %v2114_v21 = vrot.slane %v1995_v28, 2  ;;  %v1687_v13 = vadd.f32 %v1655_v3, %v1619_v37  ;;  %v4234_v49 = vmul.f32 %v3218_v25, %v3802_v39  ;;  %v859_v29 = vmul.f32 %v3220_v26, %v3799_v48 }
  0xbb   : > { %v1559_v9 = vsel %vm943_vm4, %v5310_v62, %v1558_v59  ;;  %v1871_v40 = vsel %vm698_vm3, %v5311_v34, %v1870_v32  ;;  %v1147_v18 = vadd.f32 %v1115_v7, %v1079_v22  ;;  %v5312_v10 = vrot.slane %v4132_v55, 2  ;;  %v4272_v32 = vld [vmem:[#allocation2 + $0x98] sm:$0xff]  ;;  %v465_v34 = vld [vmem:[%s3902_s17 + $0x28] sm:$0x3]  ;;  %s5209_s17 = scalar_lea.hbm %s5269_s6, %s2838_s11 }
  0xbc   : > { %v719_v44 = vrot.slane %v614_v4, 1  ;;  %v4243_v36 = vmul.f32 %v3220_v26, %v3802_v39  ;;  %v1100_v3 = vmul.f32 %v3228_v30, %v4034_v11  ;;  %v1931_v53 = vadd.f32 %v1831_v12, %v1687_v13  ;;  %472 = vst.msk [vmem:[#allocation2 + $0x1a8] sm:$0x3] %vm413_vm2, %v465_v34 }
  0xbd   : > { %v2115_v61 = vsel %vm943_vm4, %v5312_v10, %v2114_v21  ;;  %v1391_v1 = vadd.f32 %v1315_v45, %v1147_v18  ;;  %v720_v14 = vrot.slane %v4234_v49, 1  ;;  %v964_v7 = vrot.slane %v859_v29, 2 }
  0xbe   : > { %v965_v58 = vrot.slane %v4243_v36, 2  ;;  %v1172_v48 = vmul.f32 %v3230_v31, %v4034_v11  ;;  %v4253_v55 = vmul.f32 %v3230_v31, %v4038_v46  ;;  %v1416_v19 = vmul.f32 %v3238_v35, %v4034_v11 }
  0xbf   : > { %v2175_v27 = vadd.f32 %v2075_v2, %v1931_v53  ;;  %v1635_v51 = vadd.f32 %v1559_v9, %v1391_v1  ;;  %v721_v12 = vsel %vm698_vm3, %v719_v44, %v720_v14  ;;  %v4262_v0 = vmul.f32 %v3238_v35, %v4038_v46 }
  0xc0   : > { %v819_v6 = vadd.f32 %v721_v12, %v542_v52  ;;  %v966_v50 = vsel %vm943_vm4, %v964_v7, %v965_v58  ;;  %v1276_v63 = vrot.slane %v1172_v48, 1  ;;  %v1277_v23 = vrot.slane %v4253_v55, 1 }
  0xc1   : > { %v2214_v2 = vadd.f32 %v4203_v47, %v2175_v27  ;;  %v1703_v57 = vadd.f32 %v1671_v60, %v1635_v51  ;;  %v1520_v20 = vrot.slane %v1416_v19, 2  ;;  %v1521_v59 = vrot.slane %v4262_v0, 2  ;;  %v4425_v0 = vld [vmem:[#allocation2 + $0x160] sm:$0x3] }
  0xc2   : > { %v1064_v28 = vadd.f32 %v966_v50, %v819_v6  ;;  %v1278_v37 = vsel %vm698_vm3, %v1276_v63, %v1277_v23  ;;  %v1656_v22 = vmul.f32 %v3248_v41, %v4269_v15  ;;  %v1728_v45 = vmul.f32 %v3250_v42, %v4269_v15 }
  0xc3   : > { %v2246_v52 = vmax.f32 %v2214_v2, 0.0  ;;  %v1947_v60 = vadd.f32 %v1871_v40, %v1703_v57  ;;  %v1522_v62 = vsel %vm943_vm4, %v1520_v20, %v1521_v59  ;;  %v4286_v9 = vmul.f32 %v3250_v42, %v4272_v32 }
  0xc4   : > { %v1132_v21 = vadd.f32 %v1100_v3, %v1064_v28  ;;  %v1832_v4 = vrot.slane %v1728_v45, 1  ;;  %v1972_v13 = vmul.f32 %v3252_v43, %v4269_v15  ;;  %v4293_v18 = vmul.f32 %v3252_v43, %v4272_v32 }
  0xc5   : > { %2884 = vmatmul.mubr.msk.f32.gmra.mrb[6].mxu0 %vm410_vm1, %v2246_v52  ;;  %v2191_v40 = vadd.f32 %v2115_v61, %v1947_v60  ;;  %v1833_v29 = vrot.slane %v4286_v9, 1  ;;  %v558_v10 = vmul.f32 %v3216_v24, %v3862_v16  ;;  %v638_v44 = vmul.f32 %v3218_v25, %v3862_v16  ;;  %v4334_v52 = vld [vmem:[#allocation2 + $0x150] sm:$0xff] }
  0xc6   : > { %v1376_v3 = vadd.f32 %v1278_v37, %v1132_v21  ;;  %v2076_v53 = vrot.slane %v1972_v13, 2  ;;  %v2077_v1 = vrot.slane %v4293_v18, 2  ;;  %v4305_v7 = vmul.f32 %v3218_v25, %v3876_v56 }
  0xc7   : > { %v2230_v48 = vadd.f32 %v4203_v47, %v2191_v40  ;;  %v1834_v61 = vsel %vm698_vm3, %v1832_v4, %v1833_v29  ;;  %v759_v19 = vrot.slane %v638_v44, 1  ;;  %v883_v27 = vmul.f32 %v3220_v26, %v3862_v16  ;;  %v4348_v44 = vld [vmem:[#allocation2 + $0x158] sm:$0xff] }
  0xc8   : > { %v1620_v51 = vadd.f32 %v1522_v62, %v1376_v3  ;;  %v2078_v12 = vsel %vm943_vm4, %v2076_v53, %v2077_v1  ;;  %v760_v6 = vrot.slane %v4305_v7, 1  ;;  %v4319_v50 = vmul.f32 %v3220_v26, %v3876_v56 }
  0xc9   : > { %v2262_v63 = vmax.f32 %v2230_v48, 0.0  ;;  %v1004_v2 = vrot.slane %v883_v27, 2  ;;  %v1116_v57 = vmul.f32 %v3228_v30, %v4099_v38  ;;  %v1196_v20 = vmul.f32 %v3230_v31, %v4099_v38 }
  0xca   : > { %v1688_v16 = vadd.f32 %v1656_v22, %v1620_v51  ;;  %v761_v28 = vsel %vm698_vm3, %v759_v19, %v760_v6  ;;  %v1005_v37 = vrot.slane %v4319_v50, 2  ;;  %v4331_v45 = vmul.f32 %v3230_v31, %v4113_v5 }
  0xcb   : > { %2908 = vmatmul.mubr.msk.f32.gmra.mrb[6].mxu1 %vm410_vm1, %v2262_v63  ;;  %v835_v60 = vadd.f32 %v761_v28, %v558_v10  ;;  %v1316_v62 = vrot.slane %v1196_v20, 1  ;;  %v1440_v34 = vmul.f32 %v3238_v35, %v4099_v38  ;;  %v4340_v22 = vmul.f32 %v3238_v35, %v4113_v5 }
  0xcc   : > { %v1932_v21 = vadd.f32 %v1834_v61, %v1688_v16  ;;  %v1006_v4 = vsel %vm943_vm4, %v1004_v2, %v1005_v37  ;;  %v5287_v13 = vrot.slane %v4331_v45, 1  ;;  %v1672_v40 = vmul.f32 %v3248_v41, %v4334_v52 }
  0xcd   : > { %v1080_v10 = vadd.f32 %v1006_v4, %v835_v60  ;;  %v1560_v3 = vrot.slane %v1440_v34, 2  ;;  %v5286_v53 = vrot.slane %v4340_v22, 2  ;;  %v1752_v48 = vmul.f32 %v3250_v42, %v4334_v52 }
  0xce   : > { %v2176_v19 = vadd.f32 %v2078_v12, %v1932_v21  ;;  %v1318_v61 = vsel %vm698_vm3, %v1316_v62, %v5287_v13  ;;  %v4358_v27 = vmul.f32 %v3250_v42, %v4348_v44  ;;  %v1996_v51 = vmul.f32 %v3252_v43, %v4334_v52 }
  0xcf   : > { %v1148_v63 = vadd.f32 %v1116_v57, %v1080_v10  ;;  %v1562_v2 = vsel %vm943_vm4, %v1560_v3, %v5286_v53  ;;  %v1872_v20 = vrot.slane %v1752_v48, 1  ;;  %v4367_v12 = vmul.f32 %v3252_v43, %v4348_v44 }
  0xd0   : > { %v2215_v16 = vadd.f32 %v4203_v47, %v2176_v19  ;;  %v5284_v28 = vrot.slane %v4358_v27, 1  ;;  %v2116_v60 = vrot.slane %v1996_v51, 2  ;;  %v543_v62 = vmul.f32 %v3216_v24, %v3802_v39  ;;  %v4388_v51 = vld [vmem:[#allocation2 + $0xa0] sm:$0x3] }
  0xd1   : > { %v1392_v34 = vadd.f32 %v1318_v61, %v1148_v63  ;;  %v5285_v57 = vrot.slane %v4367_v12, 2  ;;  %v616_v21 = vmul.f32 %v3218_v25, %v3927_v54  ;;  %v861_v4 = vmul.f32 %v3220_v26, %v3927_v54 }
  0xd2   : > { %v2247_v10 = vmax.f32 %v2215_v16, 0.0  ;;  %v1874_v3 = vsel %vm698_vm3, %v1872_v20, %v5284_v28  ;;  %v1101_v48 = vmul.f32 %v3228_v30, %v4038_v46  ;;  %v1174_v39 = vmul.f32 %v3230_v31, %v4155_v8 }
  0xd3   : > { %v1636_v19 = vadd.f32 %v1562_v2, %v1392_v34  ;;  %v2118_v61 = vsel %vm943_vm4, %v2116_v60, %v5285_v57  ;;  %v722_v63 = vrot.slane %v616_v21, 1  ;;  %v967_v54 = vrot.slane %v861_v4, 2 }
  0xd4   : > { %2886 = vmatprep.mubr.msk.f32.mxu0 %vm410_vm1, %v2247_v10  ;;  %v1279_v16 = vrot.slane %v1174_v39, 1  ;;  %v1418_v20 = vmul.f32 %v3238_v35, %v4155_v8  ;;  %v1657_v28 = vmul.f32 %v3248_v41, %v4272_v32  ;;  %v1730_v2 = vmul.f32 %v3250_v42, %v4388_v51 }
  0xd5   : > { %v1704_v34 = vadd.f32 %v1672_v40, %v1636_v19  ;;  %v723_v60 = vsel %vm698_vm3, %v720_v14, %v722_v63  ;;  %v968_v21 = vsel %vm943_vm4, %v965_v58, %v967_v54  ;;  %v1974_v4 = vmul.f32 %v3252_v43, %v4388_v51 }
  0xd6   : > { %v820_v10 = vadd.f32 %v723_v60, %v543_v62  ;;  %v1280_v39 = vsel %vm698_vm3, %v1277_v23, %v1279_v16  ;;  %v1523_v57 = vrot.slane %v1418_v20, 2  ;;  %v1835_v53 = vrot.slane %v1730_v2, 1 }
  0xd7   : > { %v1948_v13 = vadd.f32 %v1874_v3, %v1704_v34  ;;  %v2079_v40 = vrot.slane %v1974_v4, 2  ;;  %v559_v49 = vmul.f32 %v3216_v24, %v3876_v56  ;;  %v640_v36 = vmul.f32 %v3218_v25, %v3964_v17 }
  0xd8   : > { %v1065_v14 = vadd.f32 %v968_v21, %v820_v10  ;;  %v1524_v58 = vsel %vm943_vm4, %v1521_v59, %v1523_v57  ;;  %v1836_v55 = vsel %vm698_vm3, %v1833_v29, %v1835_v53  ;;  %v885_v23 = vmul.f32 %v3220_v26, %v3964_v17 }
  0xd9   : > { %v2192_v62 = vadd.f32 %v2118_v61, %v1948_v13  ;;  %v2080_v56 = vsel %vm943_vm4, %v2077_v1, %v2079_v40  ;;  %v762_v3 = vrot.slane %v640_v36, 1  ;;  %v1117_v19 = vmul.f32 %v3228_v30, %v4113_v5 }
  0xda   : > { %v1133_v63 = vadd.f32 %v1101_v48, %v1065_v14  ;;  %v1007_v59 = vrot.slane %v885_v23, 2  ;;  %v1198_v9 = vmul.f32 %v3230_v31, %v4194_v33  ;;  %v1442_v29 = vmul.f32 %v3238_v35, %v4194_v33 }
  0xdb   : > { %v2231_v17 = vadd.f32 %v4203_v47, %v2192_v62  ;;  %v763_v18 = vsel %vm698_vm3, %v760_v6, %v762_v3  ;;  %v1673_v1 = vmul.f32 %v3248_v41, %v4348_v44  ;;  %v1754_v13 = vmul.f32 %v3250_v42, %v4425_v0 }
  0xdc   : > { %v1377_v53 = vadd.f32 %v1280_v39, %v1133_v63  ;;  %v836_v57 = vadd.f32 %v763_v18, %v559_v49  ;;  %v1008_v48 = vsel %vm943_vm4, %v1005_v37, %v1007_v59  ;;  %v1319_v61 = vrot.slane %v1198_v9, 1 }
  0xdd   : > { %v2263_v54 = vmax.f32 %v2231_v17, 0.0  ;;  %v1563_v16 = vrot.slane %v1442_v29, 2  ;;  %v1875_v20 = vrot.slane %v1754_v13, 1  ;;  %v1998_v7 = vmul.f32 %v3252_v43, %v4425_v0 }
  0xde   : > { %v1621_v6 = vadd.f32 %v1524_v58, %v1377_v53  ;;  %v1081_v2 = vadd.f32 %v1008_v48, %v836_v57  ;;  %v5313_v34 = vrot.slane %v4331_v45, 1  ;;  %v544_v21 = vmul.f32 %v3216_v24, %v4034_v11 }
  0xdf   : > { %2910 = vmatprep.mubr.msk.f32.mxu1 %vm410_vm1, %v2263_v54  ;;  %v5314_v50 = vrot.slane %v4340_v22, 2  ;;  %v5315_v4 = vrot.slane %v4358_v27, 1  ;;  %v2119_v39 = vrot.slane %v1998_v7, 2  ;;  %v617_v40 = vmul.f32 %v3218_v25, %v4034_v11  ;;  %v4495_v54 = vld [vmem:[#allocation2 + $0xa8] sm:$0xff]  ;;  %v4498_v7 = vld [vmem:[#allocation2 + $0xb0] sm:$0xff] }
  0xe0   : > { %v1320_v60 = vsel %vm698_vm3, %v5313_v34, %v1319_v61  ;;  %v1689_v45 = vadd.f32 %v1657_v28, %v1621_v6  ;;  %v1149_v49 = vadd.f32 %v1117_v19, %v1081_v2  ;;  %v4460_v36 = vmul.f32 %v3218_v25, %v4038_v46 }
  0xe1   : > { %v1564_v37 = vsel %vm943_vm4, %v5314_v50, %v1563_v16  ;;  %v1876_v10 = vsel %vm698_vm3, %v5315_v4, %v1875_v20  ;;  %v862_v14 = vmul.f32 %v3220_v26, %v4034_v11  ;;  %v5316_v22 = vrot.slane %v4367_v12, 2 }
  0xe2   : > { %v724_v27 = vrot.slane %v617_v40, 1  ;;  %v4469_v23 = vmul.f32 %v3220_v26, %v4038_v46  ;;  %v1102_v28 = vmul.f32 %v3228_v30, %v4269_v15  ;;  %v1933_v62 = vadd.f32 %v1836_v55, %v1689_v45 }
  0xe3   : > { %v2120_v58 = vsel %vm943_vm4, %v5316_v22, %v2119_v39  ;;  %v1393_v3 = vadd.f32 %v1320_v60, %v1149_v49  ;;  %v725_v19 = vrot.slane %v4460_v36, 1  ;;  %v969_v63 = vrot.slane %v862_v14, 2 }
  0xe4   : > { %v970_v59 = vrot.slane %v4469_v23, 2  ;;  %v1175_v11 = vmul.f32 %v3230_v31, %v4269_v15  ;;  %v4479_v12 = vmul.f32 %v3230_v31, %v4272_v32  ;;  %v1419_v9 = vmul.f32 %v3238_v35, %v4269_v15 }
  0xe5   : > { %v2177_v29 = vadd.f32 %v2080_v56, %v1933_v62  ;;  %v1637_v17 = vadd.f32 %v1564_v37, %v1393_v3  ;;  %v726_v55 = vsel %vm698_vm3, %v724_v27, %v725_v19  ;;  %v4488_v18 = vmul.f32 %v3238_v35, %v4272_v32 }
  0xe6   : > { %v821_v13 = vadd.f32 %v726_v55, %v544_v21  ;;  %v971_v53 = vsel %vm943_vm4, %v969_v63, %v970_v59  ;;  %v1281_v57 = vrot.slane %v1175_v11, 1  ;;  %v1282_v48 = vrot.slane %v4479_v12, 1 }
  0xe7   : > { %v2216_v61 = vadd.f32 %v4203_v47, %v2177_v29  ;;  %v1705_v56 = vadd.f32 %v1673_v1, %v1637_v17  ;;  %v1525_v16 = vrot.slane %v1419_v9, 2  ;;  %v1526_v20 = vrot.slane %v4488_v18, 2  ;;  %v4649_v18 = vld [vmem:[#allocation2 + $0x178] sm:$0x3] }
  0xe8   : > { %v1066_v6 = vadd.f32 %v971_v53, %v821_v13  ;;  %v1283_v2 = vsel %vm698_vm3, %v1281_v57, %v1282_v48  ;;  %v1658_v34 = vmul.f32 %v3248_v41, %v4495_v54  ;;  %v1731_v60 = vmul.f32 %v3250_v42, %v4495_v54 }
  0xe9   : > { %v2248_v21 = vmax.f32 %v2216_v61, 0.0  ;;  %v1949_v1 = vadd.f32 %v1876_v10, %v1705_v56  ;;  %v1527_v50 = vsel %vm943_vm4, %v1525_v16, %v1526_v20  ;;  %v4512_v37 = vmul.f32 %v3250_v42, %v4498_v7 }
  0xea   : > { %v1134_v4 = vadd.f32 %v1102_v28, %v1066_v6  ;;  %v1837_v39 = vrot.slane %v1731_v60, 1  ;;  %v1975_v40 = vmul.f32 %v3252_v43, %v4495_v54  ;;  %v4518_v45 = vmul.f32 %v3252_v43, %v4498_v7  ;;  %v4558_v60 = vld [vmem:[#allocation2 + $0x168] sm:$0xff] }
  0xeb   : > { %2887 = vmatmul.mubr.msk.f32.gmra.mrb[8].mxu0 %vm410_vm1, %v2248_v21  ;;  %v2193_v10 = vadd.f32 %v2120_v58, %v1949_v1  ;;  %v1838_v49 = vrot.slane %v4512_v37, 1  ;;  %v560_v14 = vmul.f32 %v3216_v24, %v4099_v38  ;;  %v641_v22 = vmul.f32 %v3218_v25, %v4099_v38 }
  0xec   : > { %v1378_v27 = vadd.f32 %v1283_v2, %v1134_v4  ;;  %v2081_v28 = vrot.slane %v1975_v40, 2  ;;  %v2082_v62 = vrot.slane %v4518_v45, 2  ;;  %v4529_v3 = vmul.f32 %v3218_v25, %v4113_v5 }
  0xed   : > { %v2232_v63 = vadd.f32 %v4203_v47, %v2193_v10  ;;  %v1839_v58 = vsel %vm698_vm3, %v1837_v39, %v1838_v49  ;;  %v764_v11 = vrot.slane %v641_v22, 1  ;;  %v886_v9 = vmul.f32 %v3220_v26, %v4099_v38  ;;  %v4572_v22 = vld [vmem:[#allocation2 + $0x170] sm:$0xff] }
  0xee   : > { %v1622_v29 = vadd.f32 %v1527_v50, %v1378_v27  ;;  %v2083_v17 = vsel %vm943_vm4, %v2081_v28, %v2082_v62  ;;  %v765_v55 = vrot.slane %v4529_v3, 1  ;;  %v4543_v13 = vmul.f32 %v3220_v26, %v4113_v5 }
  0xef   : > { %v2264_v53 = vmax.f32 %v2232_v63, 0.0  ;;  %v1009_v57 = vrot.slane %v886_v9, 2  ;;  %v1118_v61 = vmul.f32 %v3228_v30, %v4334_v52  ;;  %v1199_v56 = vmul.f32 %v3230_v31, %v4334_v52 }
  0xf0   : > { %v1690_v38 = vadd.f32 %v1658_v34, %v1622_v29  ;;  %v766_v16 = vsel %vm698_vm3, %v764_v11, %v765_v55  ;;  %v1010_v6 = vrot.slane %v4543_v13, 2  ;;  %v4555_v2 = vmul.f32 %v3230_v31, %v4348_v44 }
  0xf1   : > { %2911 = vmatmul.mubr.msk.f32.gmra.mrb[8].mxu1 %vm410_vm1, %v2264_v53  ;;  %v837_v21 = vadd.f32 %v766_v16, %v560_v14  ;;  %v1321_v1 = vrot.slane %v1199_v56, 1  ;;  %v1443_v50 = vmul.f32 %v3238_v35, %v4334_v52  ;;  %v4564_v34 = vmul.f32 %v3238_v35, %v4348_v44 }
  0xf2   : > { %v1934_v4 = vadd.f32 %v1839_v58, %v1690_v38  ;;  %v1011_v39 = vsel %vm943_vm4, %v1009_v57, %v1010_v6  ;;  %v5291_v40 = vrot.slane %v4555_v2, 1  ;;  %v1674_v10 = vmul.f32 %v3248_v41, %v4558_v60 }
  0xf3   : > { %v1082_v14 = vadd.f32 %v1011_v39, %v837_v21  ;;  %v1565_v27 = vrot.slane %v1443_v50, 2  ;;  %v5290_v28 = vrot.slane %v4564_v34, 2  ;;  %v1755_v63 = vmul.f32 %v3250_v42, %v4558_v60 }
  0xf4   : > { %v2178_v11 = vadd.f32 %v2083_v17, %v1934_v4  ;;  %v1323_v58 = vsel %vm698_vm3, %v1321_v1, %v5291_v40  ;;  %v4582_v9 = vmul.f32 %v3250_v42, %v4572_v22  ;;  %v1999_v29 = vmul.f32 %v3252_v43, %v4558_v60 }
  0xf5   : > { %v1150_v53 = vadd.f32 %v1118_v61, %v1082_v14  ;;  %v1567_v57 = vsel %vm943_vm4, %v1565_v27, %v5290_v28  ;;  %v1877_v56 = vrot.slane %v1755_v63, 1  ;;  %v4591_v17 = vmul.f32 %v3252_v43, %v4572_v22 }
  0xf6   : > { %v2217_v38 = vadd.f32 %v4203_v47, %v2178_v11  ;;  %v5288_v16 = vrot.slane %v4582_v9, 1  ;;  %v2121_v21 = vrot.slane %v1999_v29, 2  ;;  %v545_v1 = vmul.f32 %v3216_v24, %v4038_v46  ;;  %v4612_v29 = vld [vmem:[#allocation2 + $0xb8] sm:$0x3] }
  0xf7   : > { %v1394_v50 = vadd.f32 %v1323_v58, %v1150_v53  ;;  %v5289_v61 = vrot.slane %v4591_v17, 2  ;;  %v619_v4 = vmul.f32 %v3218_v25, %v4155_v8  ;;  %v864_v39 = vmul.f32 %v3220_v26, %v4155_v8 }
  0xf8   : > { %v2249_v14 = vmax.f32 %v2217_v38, 0.0  ;;  %v1879_v27 = vsel %vm698_vm3, %v1877_v56, %v5288_v16  ;;  %v1103_v63 = vmul.f32 %v3228_v30, %v4272_v32  ;;  %v1177_v46 = vmul.f32 %v3230_v31, %v4388_v51 }
  0xf9   : > { %v1638_v11 = vadd.f32 %v1567_v57, %v1394_v50  ;;  %v2123_v58 = vsel %vm943_vm4, %v2121_v21, %v5289_v61  ;;  %v727_v53 = vrot.slane %v619_v4, 1  ;;  %v972_v8 = vrot.slane %v864_v39, 2 }
  0xfa   : > { %2889 = vmatprep.mubr.msk.f32.mxu0 %vm410_vm1, %v2249_v14  ;;  %v1284_v38 = vrot.slane %v1177_v46, 1  ;;  %v1421_v56 = vmul.f32 %v3238_v35, %v4388_v51  ;;  %v1659_v16 = vmul.f32 %v3248_v41, %v4498_v7  ;;  %v1733_v57 = vmul.f32 %v3250_v42, %v4612_v29 }
  0xfb   : > { %v1706_v50 = vadd.f32 %v1674_v10, %v1638_v11  ;;  %v728_v21 = vsel %vm698_vm3, %v725_v19, %v727_v53  ;;  %v973_v4 = vsel %vm943_vm4, %v970_v59, %v972_v8  ;;  %v1977_v39 = vmul.f32 %v3252_v43, %v4612_v29 }
  0xfc   : > { %v822_v14 = vadd.f32 %v728_v21, %v545_v1  ;;  %v1285_v46 = vsel %vm698_vm3, %v1282_v48, %v1284_v38  ;;  %v1528_v61 = vrot.slane %v1421_v56, 2  ;;  %v1840_v28 = vrot.slane %v1733_v57, 1 }
  0xfd   : > { %v1950_v40 = vadd.f32 %v1879_v27, %v1706_v50  ;;  %v2084_v10 = vrot.slane %v1977_v39, 2  ;;  %v561_v36 = vmul.f32 %v3216_v24, %v4113_v5  ;;  %v643_v23 = vmul.f32 %v3218_v25, %v4194_v33 }
  0xfe   : > { %v1067_v19 = vadd.f32 %v973_v4, %v822_v14  ;;  %v1529_v59 = vsel %vm943_vm4, %v1526_v20, %v1528_v61  ;;  %v1841_v12 = vsel %vm698_vm3, %v1838_v49, %v1840_v28  ;;  %v888_v48 = vmul.f32 %v3220_v26, %v4194_v33 }
  0xff   : > { %v2194_v1 = vadd.f32 %v2123_v58, %v1950_v40  ;;  %v2085_v5 = vsel %vm943_vm4, %v2082_v62, %v2084_v10  ;;  %v767_v27 = vrot.slane %v643_v23, 1  ;;  %v1119_v11 = vmul.f32 %v3228_v30, %v4348_v44 }
 0x100   : > { %v1135_v53 = vadd.f32 %v1103_v63, %v1067_v19  ;;  %v1012_v20 = vrot.slane %v888_v48, 2  ;;  %v1201_v37 = vmul.f32 %v3230_v31, %v4425_v0  ;;  %v1445_v49 = vmul.f32 %v3238_v35, %v4425_v0 }
 0x101   : > { %v2233_v33 = vadd.f32 %v4203_v47, %v2194_v1  ;;  %v768_v45 = vsel %vm698_vm3, %v765_v55, %v767_v27  ;;  %v1675_v62 = vmul.f32 %v3248_v41, %v4572_v22  ;;  %v1757_v40 = vmul.f32 %v3250_v42, %v4649_v18 }
 0x102   : > { %v1379_v28 = vadd.f32 %v1285_v46, %v1135_v53  ;;  %v838_v61 = vadd.f32 %v768_v45, %v561_v36  ;;  %v1013_v63 = vsel %vm943_vm4, %v1010_v6, %v1012_v20  ;;  %v1324_v58 = vrot.slane %v1201_v37, 1 }
 0x103   : > { %v2265_v8 = vmax.f32 %v2233_v33, 0.0  ;;  %v1568_v38 = vrot.slane %v1445_v49, 2  ;;  %v1880_v56 = vrot.slane %v1757_v40, 1  ;;  %v2001_v3 = vmul.f32 %v3252_v43, %v4649_v18 }
 0x104   : > { %v1623_v55 = vadd.f32 %v1529_v59, %v1379_v28  ;;  %v1083_v57 = vadd.f32 %v1013_v63, %v838_v61  ;;  %v5317_v50 = vrot.slane %v4555_v2, 1  ;;  %v546_v4 = vmul.f32 %v3216_v24, %v4269_v15 }
 0x105   : > { %2913 = vmatprep.mubr.msk.f32.mxu1 %vm410_vm1, %v2265_v8  ;;  %v5318_v13 = vrot.slane %v4564_v34, 2  ;;  %v5319_v39 = vrot.slane %v4582_v9, 1  ;;  %v2124_v46 = vrot.slane %v2001_v3, 2  ;;  %v620_v10 = vmul.f32 %v3218_v25, %v4269_v15 }
 0x106   : > { %v1325_v21 = vsel %vm698_vm3, %v5317_v50, %v1324_v58  ;;  %v1691_v2 = vadd.f32 %v1659_v16, %v1623_v55  ;;  %v1151_v36 = vadd.f32 %v1119_v11, %v1083_v57  ;;  %v4684_v23 = vmul.f32 %v3218_v25, %v4272_v32  ;;  %v4723_v55 = vld [vmem:[#allocation2 + $0xc0] sm:$0xff] }
 0x107   : > { %v1569_v6 = vsel %vm943_vm4, %v5318_v13, %v1568_v38  ;;  %v1881_v14 = vsel %vm698_vm3, %v5319_v39, %v1880_v56  ;;  %v865_v19 = vmul.f32 %v3220_v26, %v4269_v15  ;;  %v5320_v34 = vrot.slane %v4591_v17, 2  ;;  %v4732_v13 = vld [vmem:[#allocation2 + $0xc8] sm:$0xff] }
 0x108   : > { %v729_v9 = vrot.slane %v620_v10, 1  ;;  %v4693_v48 = vmul.f32 %v3220_v26, %v4272_v32  ;;  %v1104_v16 = vmul.f32 %v3228_v30, %v4495_v54  ;;  %v1935_v1 = vadd.f32 %v1841_v12, %v1691_v2 }
 0x109   : > { %v2125_v59 = vsel %vm943_vm4, %v5320_v34, %v2124_v46  ;;  %v1395_v27 = vadd.f32 %v1325_v21, %v1151_v36  ;;  %v730_v11 = vrot.slane %v4684_v23, 1  ;;  %v974_v53 = vrot.slane %v865_v19, 2 }
 0x10a   : > { %v975_v20 = vrot.slane %v4693_v48, 2  ;;  %v1178_v15 = vmul.f32 %v3230_v31, %v4495_v54  ;;  %v4703_v17 = vmul.f32 %v3230_v31, %v4498_v7  ;;  %v1422_v37 = vmul.f32 %v3238_v35, %v4495_v54 }
 0x10b   : > { %v2179_v49 = vadd.f32 %v2085_v5, %v1935_v1  ;;  %v1639_v33 = vadd.f32 %v1569_v6, %v1395_v27  ;;  %v731_v12 = vsel %vm698_vm3, %v729_v9, %v730_v11  ;;  %v4712_v45 = vmul.f32 %v3238_v35, %v4498_v7 }
 0x10c   : > { %v823_v40 = vadd.f32 %v731_v12, %v546_v4  ;;  %v976_v28 = vsel %vm943_vm4, %v974_v53, %v975_v20  ;;  %v1286_v61 = vrot.slane %v1178_v15, 1  ;;  %v1287_v63 = vrot.slane %v4703_v17, 1 }
 0x10d   : > { %v2218_v58 = vadd.f32 %v4203_v47, %v2179_v49  ;;  %v1707_v5 = vadd.f32 %v1675_v62, %v1639_v33  ;;  %v1530_v8 = vrot.slane %v1422_v37, 2  ;;  %v1531_v38 = vrot.slane %v4712_v45, 2  ;;  %v4873_v45 = vld [vmem:[#allocation2 + $0x190] sm:$0x3] }
 0x10e   : > { %v1068_v56 = vadd.f32 %v976_v28, %v823_v40  ;;  %v1288_v3 = vsel %vm698_vm3, %v1286_v61, %v1287_v63  ;;  %v1660_v57 = vmul.f32 %v4723_v55, %v3248_v41  ;;  %v1734_v50 = vmul.f32 %v4723_v55, %v3250_v42 }
 0x10f   : > { %v2250_v21 = vmax.f32 %v2218_v58, 0.0  ;;  %v1951_v4 = vadd.f32 %v1881_v14, %v1707_v5  ;;  %v1532_v62 = vsel %vm943_vm4, %v1530_v8, %v1531_v38  ;;  %v4736_v6 = vmul.f32 %v4732_v13, %v3250_v42 }
 0x110   : > { %v1136_v39 = vadd.f32 %v1104_v16, %v1068_v56  ;;  %v1842_v46 = vrot.slane %v1734_v50, 1  ;;  %v1978_v10 = vmul.f32 %v4723_v55, %v3252_v43  ;;  %v4742_v2 = vmul.f32 %v4732_v13, %v3252_v43  ;;  %v4782_v50 = vld [vmem:[#allocation2 + $0x180] sm:$0xff] }
 0x111   : > { %2890 = vmatmul.mubr.msk.f32.gmra.mrb[10].mxu0 %vm410_vm1, %v2250_v21  ;;  %v2195_v14 = vadd.f32 %v2125_v59, %v1951_v4  ;;  %v1843_v36 = vrot.slane %v4736_v6, 1  ;;  %v562_v19 = vmul.f32 %v3216_v24, %v4334_v52  ;;  %v644_v34 = vmul.f32 %v3218_v25, %v4334_v52 }
 0x112   : > { %v1380_v9 = vadd.f32 %v1288_v3, %v1136_v39  ;;  %v2086_v16 = vrot.slane %v1978_v10, 2  ;;  %v2087_v1 = vrot.slane %v4742_v2, 2  ;;  %v4753_v27 = vmul.f32 %v3218_v25, %v4348_v44 }
 0x113   : > { %v2234_v53 = vadd.f32 %v4203_v47, %v2195_v14  ;;  %v1844_v59 = vsel %vm698_vm3, %v1842_v46, %v1843_v36  ;;  %v769_v15 = vrot.slane %v644_v34, 1  ;;  %v889_v37 = vmul.f32 %v3220_v26, %v4334_v52  ;;  %v4796_v34 = vld [vmem:[#allocation2 + $0x188] sm:$0xff] }
 0x114   : > { %v1624_v49 = vadd.f32 %v1532_v62, %v1380_v9  ;;  %v2088_v33 = vsel %vm943_vm4, %v2086_v16, %v2087_v1  ;;  %v770_v12 = vrot.slane %v4753_v27, 1  ;;  %v4767_v40 = vmul.f32 %v3220_v26, %v4348_v44 }
 0x115   : > { %v2266_v28 = vmax.f32 %v2234_v53, 0.0  ;;  %v1014_v61 = vrot.slane %v889_v37, 2  ;;  %v1120_v58 = vmul.f32 %v3228_v30, %v4558_v60  ;;  %v1202_v5 = vmul.f32 %v3230_v31, %v4558_v60 }
 0x116   : > { %v1692_v52 = vadd.f32 %v1660_v57, %v1624_v49  ;;  %v771_v8 = vsel %vm698_vm3, %v769_v15, %v770_v12  ;;  %v1015_v56 = vrot.slane %v4767_v40, 2  ;;  %v4779_v3 = vmul.f32 %v3230_v31, %v4572_v22 }
 0x117   : > { %2914 = vmatmul.mubr.msk.f32.gmra.mrb[10].mxu1 %vm410_vm1, %v2266_v28  ;;  %v839_v21 = vadd.f32 %v771_v8, %v562_v19  ;;  %v1326_v4 = vrot.slane %v1202_v5, 1  ;;  %v1446_v62 = vmul.f32 %v3238_v35, %v4558_v60  ;;  %v4788_v57 = vmul.f32 %v3238_v35, %v4572_v22 }
 0x118   : > { %v1936_v39 = vadd.f32 %v1844_v59, %v1692_v52  ;;  %v1016_v46 = vsel %vm943_vm4, %v1014_v61, %v1015_v56  ;;  %v5295_v10 = vrot.slane %v4779_v3, 1  ;;  %v1676_v14 = vmul.f32 %v3248_v41, %v4782_v50 }
 0x119   : > { %v1084_v19 = vadd.f32 %v1016_v46, %v839_v21  ;;  %v1570_v9 = vrot.slane %v1446_v62, 2  ;;  %v5294_v16 = vrot.slane %v4788_v57, 2  ;;  %v1758_v53 = vmul.f32 %v3250_v42, %v4782_v50 }
 0x11a   : > { %v2180_v15 = vadd.f32 %v2088_v33, %v1936_v39  ;;  %v1328_v59 = vsel %vm698_vm3, %v1326_v4, %v5295_v10  ;;  %v4806_v37 = vmul.f32 %v3250_v42, %v4796_v34  ;;  %v2002_v49 = vmul.f32 %v3252_v43, %v4782_v50 }
 0x11b   : > { %v1152_v28 = vadd.f32 %v1120_v58, %v1084_v19  ;;  %v1572_v61 = vsel %vm943_vm4, %v1570_v9, %v5294_v16  ;;  %v1882_v5 = vrot.slane %v1758_v53, 1  ;;  %v4815_v33 = vmul.f32 %v3252_v43, %v4796_v34 }
 0x11c   : > { %v2219_v52 = vadd.f32 %v4203_v47, %v2180_v15  ;;  %v5292_v8 = vrot.slane %v4806_v37, 1  ;;  %v2126_v21 = vrot.slane %v2002_v49, 2  ;;  %v547_v4 = vmul.f32 %v3216_v24, %v4272_v32 }
 0x11d   : > { %v1396_v62 = vadd.f32 %v1328_v59, %v1152_v28  ;;  %v5293_v58 = vrot.slane %v4815_v33, 2  ;;  %v622_v39 = vmul.f32 %v3218_v25, %v4388_v51  ;;  %v867_v46 = vmul.f32 %v3220_v26, %v4388_v51 }
 0x11e   : > { %v2251_v19 = vmax.f32 %v2219_v52, 0.0  ;;  %v1884_v9 = vsel %vm698_vm3, %v1882_v5, %v5292_v8  ;;  %v1105_v53 = vmul.f32 %v3228_v30, %v4498_v7  ;;  %v1180_v32 = vmul.f32 %v3230_v31, %v4612_v29  ;;  %v4841_v8 = vld [vmem:[#allocation2 + $0xd0] sm:$0x3] }
 0x11f   : > { %v1640_v15 = vadd.f32 %v1572_v61, %v1396_v62  ;;  %v2128_v59 = vsel %vm943_vm4, %v2126_v21, %v5293_v58  ;;  %v732_v49 = vrot.slane %v622_v39, 1  ;;  %v977_v28 = vrot.slane %v867_v46, 2 }
 0x120   : > { %2892 = vmatprep.mubr.msk.f32.mxu0 %vm410_vm1, %v2251_v19  ;;  %v1289_v51 = vrot.slane %v1180_v32, 1  ;;  %v1424_v52 = vmul.f32 %v3238_v35, %v4612_v29  ;;  %v1661_v5 = vmul.f32 %v4732_v13, %v3248_v41  ;;  %v1736_v61 = vmul.f32 %v4841_v8, %v3250_v42 }
 0x121   : > { %v1708_v62 = vadd.f32 %v1676_v14, %v1640_v15  ;;  %v733_v21 = vsel %vm698_vm3, %v730_v11, %v732_v49  ;;  %v978_v39 = vsel %vm943_vm4, %v975_v20, %v977_v28  ;;  %v1980_v46 = vmul.f32 %v4841_v8, %v3252_v43 }
 0x122   : > { %v824_v19 = vadd.f32 %v733_v21, %v547_v4  ;;  %v1290_v32 = vsel %vm698_vm3, %v1287_v63, %v1289_v51  ;;  %v1533_v58 = vrot.slane %v1424_v52, 2  ;;  %v1845_v16 = vrot.slane %v1736_v61, 1 }
 0x123   : > { %v1952_v10 = vadd.f32 %v1884_v9, %v1708_v62  ;;  %v2089_v14 = vrot.slane %v1980_v46, 2  ;;  %v563_v23 = vmul.f32 %v3216_v24, %v4348_v44  ;;  %v646_v48 = vmul.f32 %v3218_v25, %v4425_v0 }
 0x124   : > { %v1069_v11 = vadd.f32 %v978_v39, %v824_v19  ;;  %v1534_v20 = vsel %vm943_vm4, %v1531_v38, %v1533_v58  ;;  %v1846_v17 = vsel %vm698_vm3, %v1843_v36, %v1845_v16  ;;  %v891_v63 = vmul.f32 %v3220_v26, %v4425_v0 }
 0x125   : > { %v2196_v4 = vadd.f32 %v2128_v59, %v1952_v10  ;;  %v2090_v44 = vsel %vm943_vm4, %v2087_v1, %v2089_v14  ;;  %v772_v9 = vrot.slane %v646_v48, 1  ;;  %v1121_v15 = vmul.f32 %v3228_v30, %v4572_v22  ;;  %v4897_v39 = vpop.f32.mrb[0].mxu0 }
 0x126   : > { %v1137_v49 = vadd.f32 %v1105_v53, %v1069_v11  ;;  %v1017_v38 = vrot.slane %v891_v63, 2  ;;  %v1204_v6 = vmul.f32 %v3230_v31, %v4649_v18  ;;  %v1448_v36 = vmul.f32 %v3238_v35, %v4649_v18  ;;  %v4908_v14 = vpop.f32.mrb[1].mxu0 }
 0x127   : > { %v2235_v0 = vadd.f32 %v4203_v47, %v2196_v4  ;;  %v773_v2 = vsel %vm698_vm3, %v770_v12, %v772_v9  ;;  %v1677_v1 = vmul.f32 %v3248_v41, %v4796_v34  ;;  %v1760_v10 = vmul.f32 %v3250_v42, %v4873_v45 }
 0x128   : > { %v1381_v16 = vadd.f32 %v1290_v32, %v1137_v49  ;;  %v840_v58 = vadd.f32 %v773_v2, %v563_v23  ;;  %v1018_v53 = vsel %vm943_vm4, %v1015_v56, %v1017_v38  ;;  %v1329_v59 = vrot.slane %v1204_v6, 1 }
 0x129   : > { %v2267_v28 = vmax.f32 %v2235_v0, 0.0  ;;  %v1573_v51 = vrot.slane %v1448_v36, 2  ;;  %v1885_v47 = vrot.slane %v1760_v10, 1  ;;  %v2004_v27 = vmul.f32 %v3252_v43, %v4873_v45 }
 0x12a   : > { %v1625_v12 = vadd.f32 %v1534_v20, %v1381_v16  ;;  %v1085_v52 = vadd.f32 %v1018_v53, %v840_v58  ;;  %v5321_v61 = vrot.slane %v4779_v3, 1  ;;  %v548_v21 = vmul.f32 %v3216_v24, %v4495_v54 }
 0x12b   : > { %2916 = vmatprep.mubr.msk.f32.mxu1 %vm410_vm1, %v2267_v28  ;;  %v5322_v40 = vrot.slane %v4788_v57, 2  ;;  %v5323_v46 = vrot.slane %v4806_v37, 1  ;;  %v2129_v32 = vrot.slane %v2004_v27, 2  ;;  %v623_v3 = vmul.f32 %v3218_v25, %v4495_v54 }
 0x12c   : > { %v1330_v62 = vsel %vm698_vm3, %v5321_v61, %v1329_v59  ;;  %v1693_v23 = vadd.f32 %v1661_v5, %v1625_v12  ;;  %v1153_v48 = vadd.f32 %v1121_v15, %v1085_v52  ;;  %v4912_v11 = vmul.f32 %v3218_v25, %v4498_v7  ;;  %v4946_v28 = vpop.f32.mrb[0].mxu1 }
 0x12d   : > { %v1574_v56 = vsel %vm943_vm4, %v5322_v40, %v1573_v51  ;;  %v1886_v19 = vsel %vm698_vm3, %v5323_v46, %v1885_v47  ;;  %v868_v57 = vmul.f32 %v3220_v26, %v4495_v54  ;;  %v5324_v20 = vrot.slane %v4815_v33, 2  ;;  %v4955_v12 = vpop.f32.mrb[1].mxu1 }
 0x12e   : > { %v734_v63 = vrot.slane %v623_v3, 1  ;;  %v4921_v4 = vmul.f32 %v3220_v26, %v4498_v7  ;;  %v1106_v5 = vmul.f32 %v4723_v55, %v3228_v30  ;;  %v1937_v9 = vadd.f32 %v1846_v17, %v1693_v23 }
 0x12f   : > { %v2130_v37 = vsel %vm943_vm4, %v5324_v20, %v2129_v32  ;;  %v1397_v15 = vadd.f32 %v1330_v62, %v1153_v48  ;;  %v735_v49 = vrot.slane %v4912_v11, 1  ;;  %v979_v38 = vrot.slane %v868_v57, 2  ;;  %v2989_v62 = vld [vmem:[#allocation2 + $0xd8] sm:$0xff]  ;;  %v4965_v32 = vld [vmem:[#allocation2 + $0xe0] sm:$0xff] }
 0x130   : > { %v980_v6 = vrot.slane %v4921_v4, 2  ;;  %v1181_v54 = vmul.f32 %v4723_v55, %v3230_v31  ;;  %v4931_v33 = vmul.f32 %v4732_v13, %v3230_v31  ;;  %v1425_v36 = vmul.f32 %v4723_v55, %v3238_v35  ;;  %v4951_v55 = vld [vmem:[%s5266_s3] ss:$0 sm:$0xff] }
 0x131   : > { %v2181_v0 = vadd.f32 %v2090_v44, %v1937_v9  ;;  %v1641_v2 = vadd.f32 %v1574_v56, %v1397_v15  ;;  %v736_v17 = vsel %vm698_vm3, %v734_v63, %v735_v49  ;;  %v4940_v10 = vmul.f32 %v4732_v13, %v3238_v35 }
 0x132   : > { %v825_v16 = vadd.f32 %v736_v17, %v548_v21  ;;  %v981_v58 = vsel %vm943_vm4, %v979_v38, %v980_v6  ;;  %v1291_v53 = vrot.slane %v1181_v54, 1  ;;  %v1292_v59 = vrot.slane %v4931_v33, 1 }
 0x133   : > { %v2220_v44 = vadd.f32 %v4951_v55, %v2181_v0  ;;  %v1709_v51 = vadd.f32 %v1677_v1, %v1641_v2  ;;  %v1535_v47 = vrot.slane %v1425_v36, 2  ;;  %v1536_v27 = vrot.slane %v4940_v10, 2 }
 0x134   : > { %v1070_v52 = vadd.f32 %v981_v58, %v825_v16  ;;  %v1293_v61 = vsel %vm698_vm3, %v1291_v53, %v1292_v59  ;;  %v1662_v21 = vmul.f32 %v2989_v62, %v3248_v41  ;;  %v1737_v40 = vmul.f32 %v2989_v62, %v3250_v42 }
 0x135   : > { %v2252_v56 = vmax.f32 %v2220_v44, 0.0  ;;  %v1953_v46 = vadd.f32 %v1886_v19, %v1709_v51  ;;  %v1537_v1 = vsel %vm943_vm4, %v1535_v47, %v1536_v27  ;;  %v4969_v3 = vmul.f32 %v4965_v32, %v3250_v42 }
 0x136   : > { %v1138_v23 = vadd.f32 %v1106_v5, %v1070_v52  ;;  %v1847_v48 = vrot.slane %v1737_v40, 1  ;;  %v1981_v57 = vmul.f32 %v2989_v62, %v3252_v43  ;;  %v4974_v20 = vmul.f32 %v4965_v32, %v3252_v43  ;;  %v524_v62 = vld [vmem:[#allocation2 + $0x198] sm:$0xff] }
 0x137   : > { %2893 = vmatmul.mubr.msk.f32.gmra.mrb[12].mxu0 %vm410_vm1, %v2252_v56  ;;  %v2197_v19 = vadd.f32 %v2130_v37, %v1953_v46  ;;  %v1848_v63 = vrot.slane %v4969_v3, 1  ;;  %v564_v9 = vmul.f32 %v3216_v24, %v4558_v60  ;;  %v647_v15 = vmul.f32 %v3218_v25, %v4558_v60 }
 0x138   : > { %v1382_v38 = vadd.f32 %v1293_v61, %v1138_v23  ;;  %v2091_v5 = vrot.slane %v1981_v57, 2  ;;  %v2092_v54 = vrot.slane %v4974_v20, 2  ;;  %v4985_v36 = vmul.f32 %v3218_v25, %v4572_v22 }
 0x139   : > { %v2236_v0 = vadd.f32 %v4951_v55, %v2197_v19  ;;  %v1849_v37 = vsel %vm698_vm3, %v1847_v48, %v1848_v63  ;;  %v774_v2 = vrot.slane %v647_v15, 1  ;;  %v892_v17 = vmul.f32 %v3220_v26, %v4558_v60 }
 0x13a   : > { %v1626_v16 = vadd.f32 %v1537_v1, %v1382_v38  ;;  %v2093_v58 = vsel %vm943_vm4, %v2091_v5, %v2092_v54  ;;  %v775_v53 = vrot.slane %v4985_v36, 1  ;;  %v4999_v44 = vmul.f32 %v3220_v26, %v4572_v22  ;;  %v5014_v1 = vld [vmem:[#allocation2 + $0x1a0] sm:$0xff] }
 0x13b   : > { %v2268_v51 = vmax.f32 %v2236_v0, 0.0  ;;  %v1019_v47 = vrot.slane %v892_v17, 2  ;;  %v1122_v52 = vmul.f32 %v3228_v30, %v4782_v50  ;;  %v1205_v61 = vmul.f32 %v3230_v31, %v4782_v50 }
 0x13c   : > { %v1694_v60 = vadd.f32 %v1662_v21, %v1626_v16  ;;  %v776_v40 = vsel %vm698_vm3, %v774_v2, %v775_v53  ;;  %v1020_v56 = vrot.slane %v4999_v44, 2  ;;  %v5011_v46 = vmul.f32 %v3230_v31, %v4796_v34 }
 0x13d   : > { %2917 = vmatmul.mubr.msk.f32.gmra.mrb[12].mxu1 %vm410_vm1, %v2268_v51  ;;  %v841_v23 = vadd.f32 %v776_v40, %v564_v9  ;;  %v1331_v48 = vrot.slane %v1205_v61, 1  ;;  %v1449_v21 = vmul.f32 %v3238_v35, %v4782_v50  ;;  %v5020_v57 = vmul.f32 %v3238_v35, %v4796_v34 }
 0x13e   : > { %v1938_v19 = vadd.f32 %v1849_v37, %v1694_v60  ;;  %v1021_v15 = vsel %vm943_vm4, %v1019_v47, %v1020_v56  ;;  %v1332_v38 = vrot.slane %v5011_v46, 1  ;;  %v1761_v9 = vmul.f32 %v3250_v42, %v524_v62 }
 0x13f   : > { %v1086_v5 = vadd.f32 %v1021_v15, %v841_v23  ;;  %v1575_v0 = vrot.slane %v1449_v21, 2  ;;  %v5296_v2 = vrot.slane %v5020_v57, 2  ;;  %v5033_v37 = vmul.f32 %v3250_v42, %v5014_v1 }
 0x140   : > { %v2182_v17 = vadd.f32 %v2093_v58, %v1938_v19  ;;  %v1333_v50 = vsel %vm698_vm3, %v1331_v48, %v1332_v38  ;;  %v2005_v16 = vmul.f32 %v3252_v43, %v524_v62  ;;  %v1678_v47 = vmul.f32 %v3248_v41, %v524_v62 }
 0x141   : > { %v1154_v51 = vadd.f32 %v1122_v52, %v1086_v5  ;;  %v5039_v61 = vmul.f32 %v3252_v43, %v5014_v1  ;;  %v1577_v58 = vsel %vm943_vm4, %v1575_v0, %v5296_v2  ;;  %v1887_v40 = vrot.slane %v1761_v9, 1 }
 0x142   : > { %v2221_v60 = vadd.f32 %v4951_v55, %v2182_v17  ;;  %v1888_v23 = vrot.slane %v5033_v37, 1  ;;  %v2131_v21 = vrot.slane %v2005_v16, 2  ;;  %v625_v52 = vmul.f32 %v3218_v25, %v4612_v29 }
 0x143   : > { %v1398_v48 = vadd.f32 %v1333_v50, %v1154_v51  ;;  %v870_v62 = vmul.f32 %v3220_v26, %v4612_v29  ;;  %v2132_v15 = vrot.slane %v5039_v61, 2  ;;  %v549_v5 = vmul.f32 %v3216_v24, %v4498_v7  ;;  %v2991_v51 = vld [vmem:[#allocation2 + $0xe8] sm:$0x3] }
 0x144   : > { %v2253_v19 = vmax.f32 %v2221_v60, 0.0  ;;  %v1183_v0 = vmul.f32 %v4841_v8, %v3230_v31  ;;  %v737_v17 = vrot.slane %v625_v52, 1  ;;  %v1889_v50 = vsel %vm698_vm3, %v1887_v40, %v1888_v23 }
 0x145   : > { %v1642_v9 = vadd.f32 %v1577_v58, %v1398_v48  ;;  %v982_v2 = vrot.slane %v870_v62, 2  ;;  %v1427_v29 = vmul.f32 %v4841_v8, %v3238_v35  ;;  %v1739_v60 = vmul.f32 %v2991_v51, %v3250_v42 }
 0x146   : > { %2895 = vmatprep.mubr.msk.f32.mxu0 %vm410_vm1, %v2253_v19  ;;  %v1294_v16 = vrot.slane %v1183_v0, 1  ;;  %v738_v58 = vsel %vm698_vm3, %v735_v49, %v737_v17  ;;  %v1983_v52 = vmul.f32 %v2991_v51, %v3252_v43  ;;  %v2133_v40 = vsel %vm943_vm4, %v2131_v21, %v2132_v15  ;;  %v526_v21 = vld [vmem:[#allocation2 + $0x1a8] sm:$0x3] }
 0x147   : > { %v1710_v7 = vadd.f32 %v1678_v47, %v1642_v9  ;;  %v983_v48 = vsel %vm943_vm4, %v980_v6, %v982_v2  ;;  %v826_v62 = vadd.f32 %v738_v58, %v549_v5  ;;  %v1107_v8 = vmul.f32 %v4732_v13, %v3228_v30 }
 0x148   : > { %v1538_v47 = vrot.slane %v1427_v29, 2  ;;  %v1295_v11 = vsel %vm698_vm3, %v1292_v59, %v1294_v16  ;;  %v1663_v4 = vmul.f32 %v4965_v32, %v3248_v41  ;;  %v649_v49 = vmul.f32 %v3218_v25, %v4649_v18 }
 0x149   : > { %v1954_v19 = vadd.f32 %v1889_v50, %v1710_v7  ;;  %v1071_v6 = vadd.f32 %v983_v48, %v826_v62  ;;  %v1850_v2 = vrot.slane %v1739_v60, 1  ;;  %v565_v5 = vmul.f32 %v3216_v24, %v4572_v22 }
 0x14a   : > { %v894_v13 = vmul.f32 %v3220_v26, %v4649_v18  ;;  %v1539_v33 = vsel %vm943_vm4, %v1536_v27, %v1538_v47  ;;  %v2094_v59 = vrot.slane %v1983_v52, 2  ;;  %v777_v32 = vrot.slane %v649_v49, 1  ;;  %v5103_v27 = vld [vmem:[%s5268_s5] ss:$0 sm:$0xff] }
 0x14b   : > { %v2198_v0 = vadd.f32 %v2133_v40, %v1954_v19  ;;  %v1139_v9 = vadd.f32 %v1107_v8, %v1071_v6  ;;  %v1207_v17 = vmul.f32 %v3230_v31, %v4873_v45  ;;  %v1451_v24 = vmul.f32 %v3238_v35, %v4873_v45 }
 0x14c   : > { %v1022_v25 = vrot.slane %v894_v13, 2  ;;  %v778_v26 = vsel %vm698_vm3, %v775_v53, %v777_v32  ;;  %v1123_v18 = vmul.f32 %v3228_v30, %v4796_v34  ;;  %v1763_v10 = vmul.f32 %v3250_v42, %v526_v21  ;;  %v2879_v29 = vpop.f32.mrb[2].mxu0 }
 0x14d   : > { %v2237_v22 = vadd.f32 %v4951_v55, %v2198_v0  ;;  %v1383_v31 = vadd.f32 %v1295_v11, %v1139_v9  ;;  %v842_v50 = vadd.f32 %v778_v26, %v565_v5  ;;  %v1334_v45 = vrot.slane %v1207_v17, 1 }
 0x14e   : > { %v1023_v35 = vsel %vm943_vm4, %v1020_v56, %v1022_v25  ;;  %v1851_v30 = vsel %vm698_vm3, %v1848_v63, %v1850_v2  ;;  %v2095_v42 = vsel %vm943_vm4, %v2092_v54, %v2094_v59  ;;  %v1578_v34 = vrot.slane %v1451_v24, 2 }
 0x14f   : > { %v2269_v36 = vmax.f32 %v2237_v22, 0.0  ;;  %v1627_v53 = vadd.f32 %v1539_v33, %v1383_v31  ;;  %v1087_v16 = vadd.f32 %v1023_v35, %v842_v50  ;;  %v1679_v44 = vmul.f32 %v3248_v41, %v5014_v1 }
 0x150   : > { %v2451_v56 = vadd.f32 %v4897_v39, %v5103_v27  ;;  %v1335_v3 = vsel %vm698_vm3, %v1332_v38, %v1334_v45  ;;  %v1890_v63 = vrot.slane %v1763_v10, 1  ;;  %v2007_v20 = vmul.f32 %v3252_v43, %v526_v21  ;;  %v2455_v39 = vpop.f32.mrb[3].mxu0 }
 0x151   : > { %2919 = vmatprep.mubr.msk.f32.mxu1 %vm410_vm1, %v2269_v36  ;;  %v2531_v54 = vadd.f32 %v4946_v28, %v5103_v27  ;;  %v1695_v51 = vadd.f32 %v1663_v4, %v1627_v53  ;;  %v1155_v60 = vadd.f32 %v1123_v18, %v1087_v16  ;;  %v2446_v41 = vadd.f32 %v5103_v27, %v4908_v14 }
 0x152   : > { %v2605_v7 = vmax.f32 %v2451_v56, 0.0  ;;  %v5325_v1 = vrot.slane %v5020_v57, 2  ;;  %v2526_v38 = vadd.f32 %v5103_v27, %v4955_v12  ;;  %v2461_v43 = vadd.f32 %v2879_v29, %v5103_v27  ;;  %v2903_v11 = vpop.f32.mrb[2].mxu1 }
 0x153   : > { %v2621_v58 = vmax.f32 %v2531_v54, 0.0  ;;  %v1939_v48 = vadd.f32 %v1851_v30, %v1695_v51  ;;  %v1399_v28 = vadd.f32 %v1335_v3, %v1155_v60  ;;  %v2604_v14 = vmax.f32 %v2446_v41, 0.0  ;;  %v2535_v2 = vpop.f32.mrb[3].mxu1 }
 0x154   : > { %v1579_v46 = vsel %vm943_vm4, %v5325_v1, %v1578_v34  ;;  %2637 = vst [vmem:[%s5135_s8 + $0x8] sm:$0xff] %v2605_v7  ;;  %v2456_v57 = vadd.f32 %v5103_v27, %v2455_v39  ;;  %v2134_v52 = vrot.slane %v2007_v20, 2  ;;  %v2620_v40 = vmax.f32 %v2526_v38, 0.0 }
 0x155   : > { %2653 = vst [vmem:[%s5135_s8 + $0x88] sm:$0xff] %v2621_v58  ;;  %v2607_v12 = vmax.f32 %v2461_v43, 0.0  ;;  %v2183_v62 = vadd.f32 %v2095_v42, %v1939_v48  ;;  %v1643_v8 = vadd.f32 %v1579_v46, %v1399_v28  ;;  %2636 = vst [vmem:[%s5135_s8] sm:$0xff] %v2604_v14  ;;  %v1891_v19 = vsel %vm698_vm3, %v1888_v23, %v1890_v63 }
 0x156   : > { %v2606_v47 = vmax.f32 %v2456_v57, 0.0  ;;  %2652 = vst [vmem:[%s5135_s8 + $0x80] sm:$0xff] %v2620_v40  ;;  %v2541_v6 = vadd.f32 %v2903_v11, %v5103_v27  ;;  %v2135_v21 = vsel %vm943_vm4, %v2132_v15, %v2134_v52  ;;  %v2536_v37 = vadd.f32 %v5103_v27, %v2535_v2 }
 0x157   : > { %2639 = vst [vmem:[%s5135_s8 + $0x18] sm:$0xff] %v2607_v12  ;;  %v2222_v4 = vadd.f32 %v4951_v55, %v2183_v62  ;;  %v1711_v49 = vadd.f32 %v1679_v44, %v1643_v8 }
 0x158   : > { %2638 = vst [vmem:[%s5135_s8 + $0x10] sm:$0xff] %v2606_v47  ;;  %v2623_v13 = vmax.f32 %v2541_v6, 0.0  ;;  %v2622_v0 = vmax.f32 %v2536_v37, 0.0 }
 0x159   : > { %v2254_v5 = vmax.f32 %v2222_v4, 0.0  ;;  %v1955_v23 = vadd.f32 %v1891_v19, %v1711_v49 }
 0x15a   : > { %2655 = vst [vmem:[%s5135_s8 + $0x98] sm:$0xff] %v2623_v13  ;;  %2654 = vst [vmem:[%s5135_s8 + $0x90] sm:$0xff] %v2622_v0 }
 0x15b   : > { %2896 = vmatmul.mubr.msk.f32.gmra.mrb[14].mxu0 %vm410_vm1, %v2254_v5  ;;  %v2199_v33 = vadd.f32 %v2135_v21, %v1955_v23 }
 0x15d   : > { %v2238_v59 = vadd.f32 %v4951_v55, %v2199_v33 }
 0x15f   : > { %v2270_v32 = vmax.f32 %v2238_v59, 0.0 }
 0x161   : > { %2920 = vmatmul.mubr.msk.f32.gmra.mrb[14].mxu1 %vm410_vm1, %v2270_v32 }
 0x172   : > { %v2882_v61 = vpop.f32.mrb[4].mxu0 }
 0x173   : > { %v2471_v15 = vadd.f32 %v2882_v61, %v5103_v27  ;;  %v2465_v9 = vpop.f32.mrb[5].mxu0 }
 0x174   : > { %v2466_v25 = vadd.f32 %v5103_v27, %v2465_v9 }
 0x175   : > { %v2609_v17 = vmax.f32 %v2471_v15, 0.0 }
 0x176   : > { %v2608_v24 = vmax.f32 %v2466_v25, 0.0 }
 0x177   : > { %2641 = vst [vmem:[%s5135_s8 + $0x28] sm:$0xff] %v2609_v17 }
 0x178   : > { %v2906_v22 = vpop.f32.mrb[4].mxu1  ;;  %2640 = vst [vmem:[%s5135_s8 + $0x20] sm:$0xff] %v2608_v24 }
 0x179   : > { %v2551_v55 = vadd.f32 %v2906_v22, %v5103_v27  ;;  %v2545_v26 = vpop.f32.mrb[5].mxu1 }
 0x17a   : > { %v2546_v18 = vadd.f32 %v5103_v27, %v2545_v26 }
 0x17b   : > { %v2625_v10 = vmax.f32 %v2551_v55, 0.0 }
 0x17c   : > { %v2624_v31 = vmax.f32 %v2546_v18, 0.0 }
 0x17d   : > { %2657 = vst [vmem:[%s5135_s8 + $0xa8] sm:$0xff] %v2625_v10 }
 0x17e   : > { %2656 = vst [vmem:[%s5135_s8 + $0xa0] sm:$0xff] %v2624_v31 }
 0x198   : > { %v2885_v50 = vpop.f32.mrb[6].mxu0 }
 0x199   : > { %v2481_v35 = vadd.f32 %v2885_v50, %v5103_v27  ;;  %v2475_v45 = vpop.f32.mrb[7].mxu0 }
 0x19a   : > { %v2476_v36 = vadd.f32 %v5103_v27, %v2475_v45 }
 0x19b   : > { %v2611_v30 = vmax.f32 %v2481_v35, 0.0 }
 0x19c   : > { %v2610_v42 = vmax.f32 %v2476_v36, 0.0 }
 0x19d   : > { %2643 = vst [vmem:[%s5135_s8 + $0x38] sm:$0xff] %v2611_v30 }
 0x19e   : > { %v2909_v34 = vpop.f32.mrb[6].mxu1  ;;  %2642 = vst [vmem:[%s5135_s8 + $0x30] sm:$0xff] %v2610_v42 }
 0x19f   : > { %v2561_v53 = vadd.f32 %v2909_v34, %v5103_v27  ;;  %v2555_v16 = vpop.f32.mrb[7].mxu1 }
 0x1a0   : > { %v2556_v44 = vadd.f32 %v5103_v27, %v2555_v16 }
 0x1a1   : > { %v2627_v56 = vmax.f32 %v2561_v53, 0.0 }
 0x1a2   : > { %v2626_v3 = vmax.f32 %v2556_v44, 0.0 }
 0x1a3   : > { %2659 = vst [vmem:[%s5135_s8 + $0xb8] sm:$0xff] %v2627_v56 }
 0x1a4   : > { %2658 = vst [vmem:[%s5135_s8 + $0xb0] sm:$0xff] %v2626_v3 }
 0x1be   : > { %v2888_v63 = vpop.f32.mrb[8].mxu0 }
 0x1bf   : > { %v2491_v20 = vadd.f32 %v2888_v63, %v5103_v27  ;;  %v2485_v54 = vpop.f32.mrb[9].mxu0 }
 0x1c0   : > { %v2486_v29 = vadd.f32 %v5103_v27, %v2485_v54 }
 0x1c1   : > { %v2613_v51 = vmax.f32 %v2491_v20, 0.0 }
 0x1c2   : > { %v2612_v60 = vmax.f32 %v2486_v29, 0.0 }
 0x1c3   : > { %2645 = vst [vmem:[%s5135_s8 + $0x48] sm:$0xff] %v2613_v51 }
 0x1c4   : > { %v2912_v7 = vpop.f32.mrb[8].mxu1  ;;  %2644 = vst [vmem:[%s5135_s8 + $0x40] sm:$0xff] %v2612_v60 }
 0x1c5   : > { %v2571_v41 = vadd.f32 %v2912_v7, %v5103_v27  ;;  %v2565_v39 = vpop.f32.mrb[9].mxu1 }
 0x1c6   : > { %v2566_v1 = vadd.f32 %v5103_v27, %v2565_v39 }
 0x1c7   : > { %v2629_v46 = vmax.f32 %v2571_v41, 0.0 }
 0x1c8   : > { %v2628_v58 = vmax.f32 %v2566_v1, 0.0 }
 0x1c9   : > { %2661 = vst [vmem:[%s5135_s8 + $0xc8] sm:$0xff] %v2629_v46 }
 0x1ca   : > { %2660 = vst [vmem:[%s5135_s8 + $0xc0] sm:$0xff] %v2628_v58 }
 0x1e4   : > { %v2891_v38 = vpop.f32.mrb[10].mxu0 }
 0x1e5   : > { %v2501_v43 = vadd.f32 %v2891_v38, %v5103_v27  ;;  %v2495_v48 = vpop.f32.mrb[11].mxu0 }
 0x1e6   : > { %v2496_v28 = vadd.f32 %v5103_v27, %v2495_v48 }
 0x1e7   : > { %v2615_v14 = vmax.f32 %v2501_v43, 0.0 }
 0x1e8   : > { %v2614_v57 = vmax.f32 %v2496_v28, 0.0 }
 0x1e9   : > { %2647 = vst [vmem:[%s5135_s8 + $0x58] sm:$0xff] %v2615_v14 }
 0x1ea   : > { %v2915_v52 = vpop.f32.mrb[10].mxu1  ;;  %2646 = vst [vmem:[%s5135_s8 + $0x50] sm:$0xff] %v2614_v57 }
 0x1eb   : > { %v2581_v40 = vadd.f32 %v2915_v52, %v5103_v27  ;;  %v2575_v12 = vpop.f32.mrb[11].mxu1 }
 0x1ec   : > { %v2576_v62 = vadd.f32 %v5103_v27, %v2575_v12 }
 0x1ed   : > { %v2631_v8 = vmax.f32 %v2581_v40, 0.0 }
 0x1ee   : > { %v2630_v47 = vmax.f32 %v2576_v62, 0.0 }
 0x1ef   : > { %2663 = vst [vmem:[%s5135_s8 + $0xd8] sm:$0xff] %v2631_v8 }
 0x1f0   : > { %2662 = vst [vmem:[%s5135_s8 + $0xd0] sm:$0xff] %v2630_v47 }
 0x20a   : > { %v2894_v19 = vpop.f32.mrb[12].mxu0 }
 0x20b   : > { %v2511_v11 = vadd.f32 %v2894_v19, %v5103_v27  ;;  %v2505_v4 = vpop.f32.mrb[13].mxu0 }
 0x20c   : > { %v2506_v49 = vadd.f32 %v5103_v27, %v2505_v4 }
 0x20d   : > { %v2617_v6 = vmax.f32 %v2511_v11, 0.0 }
 0x20e   : > { %v2616_v2 = vmax.f32 %v2506_v49, 0.0 }
 0x20f   : > { %2649 = vst [vmem:[%s5135_s8 + $0x68] sm:$0xff] %v2617_v6 }
 0x210   : > { %v2918_v21 = vpop.f32.mrb[12].mxu1  ;;  %2648 = vst [vmem:[%s5135_s8 + $0x60] sm:$0xff] %v2616_v2 }
 0x211   : > { %v2591_v37 = vadd.f32 %v2918_v21, %v5103_v27  ;;  %v2585_v5 = vpop.f32.mrb[13].mxu1 }
 0x212   : > { %v2586_v23 = vadd.f32 %v5103_v27, %v2585_v5 }
 0x213   : > { %v2633_v13 = vmax.f32 %v2591_v37, 0.0 }
 0x214   : > { %v2632_v0 = vmax.f32 %v2586_v23, 0.0 }
 0x215   : > { %2665 = vst [vmem:[%s5135_s8 + $0xe8] sm:$0xff] %v2633_v13 }
 0x216   : > { %2664 = vst [vmem:[%s5135_s8 + $0xe0] sm:$0xff] %v2632_v0 }
 0x22e   : > { %v2897_v33 = vpop.f32.mrb[14].mxu0 }
 0x22f   : > { %v2521_v59 = vadd.f32 %v2897_v33, %v5103_v27  ;;  %v2515_v32 = vpop.f32.mrb[15].mxu0 }
 0x230   : > { %v2516_v61 = vadd.f32 %v5103_v27, %v2515_v32 }
 0x231   : > { %v2619_v15 = vmax.f32 %v2521_v59, 0.0 }
 0x232   : > { %v2618_v9 = vmax.f32 %v2516_v61, 0.0 }
 0x233   : > { %2651 = vst [vmem:[%s5135_s8 + $0x78] sm:$0xff] %v2619_v15 }
 0x234   : > { %v2921_v25 = vpop.f32.mrb[14].mxu1  ;;  %2650 = vst [vmem:[%s5135_s8 + $0x70] sm:$0xff] %v2618_v9 }
 0x235   : > { %v2601_v17 = vadd.f32 %v2921_v25, %v5103_v27  ;;  %v2595_v24 = vpop.f32.mrb[15].mxu1 }
 0x236   : > { %v2596_v22 = vadd.f32 %v5103_v27, %v2595_v24 }
 0x237   : > { %v2635_v55 = vmax.f32 %v2601_v17, 0.0 }
 0x238   : > { %v2634_v26 = vmax.f32 %v2596_v22, 0.0 }
 0x239   : > { %2667 = vst [vmem:[%s5135_s8 + $0xf8] sm:$0xff] %v2635_v55 }
 0x23a   : > { %2666 = vst [vmem:[%s5135_s8 + $0xf0] sm:$0xff] %v2634_v26 }
 0x23b   : > { %3005 = shalt.err (!%p3002_p5)
}
 0x23c   : > { %s3006_s20 = scalar_lea.hbm %s5209_s17, 4096  ;;  %s3010_s30 = scalar_lea.hbm %s5269_s6, 8192 }
 0x23d   : > { %p3007_p6 = scmp.ne.s32.totalorder %s5209_s17, %s3006_s20  ;;  %p3011_p10 = scmp.lt.u32.totalorder %s5209_s17, %s5269_s6 }
 0x23e   : > { %p3012_p11 = scmp.lt.u32.totalorder %s3010_s30, %s3006_s20  ;;  %p3014_p13 = scmp.lt.u32.totalorder %s3006_s20, %s5209_s17 }
 0x23f   : > { %p3008_p7 = pnand %p3007_p6, %p3150_p4 }
 0x240   : > { %p3013_p12 = por %p3012_p11, %p3011_p10 }
 0x241   : > { %p3009_p9 = pneg %p3008_p7 }
 0x242   : > { %p3015_p0 = por %p3014_p13, %p3013_p12 }
 0x244   : > { %p3016_p1 = pnand %p3015_p0, %p3009_p9 }
 0x246   : > { %3019 = shalt.err (!%p3016_p1)
}
 0x247   : > { %s3073_s15 = smov 128   ;;  %s3074_s16 = smov 8  }
 0x248   : > { %2926 = dma.vmem_to_hbm [thread:$0]  (%p3150_p4), %s5211_s12, 4096, %s5209_s17, %s5217_s24, %s3073_s15, %s3073_s15, %s3074_s16  }
 0x249 PF: > { %p2933_p2 = scmp.ge.s32.totalorder %s3070_s26, 2  ;;  %s2700_s13 = sand.u32 1, %s3050_s21  }
 0x24a   : > { %s2701_s14 = scalar_lea.sflag [#allocation4], %s2700_s13 }
 0x24b   : > { %p2929_p3 = pnand %p2933_p2, %p3157_p8 }
 0x24d   : > { %3045 = dma.done.wait (!%p2929_p3), %s2701_s14, 4096  }
 0x24e   : > { %3047 = vsyncadd (!%p2929_p3), %s2701_s14, 4294963200  ;;  %s19_s26 = sadd.s32 1, %s3070_s26   ;;  %s5326_s21 = smov %s3054_s22 }
 0x24f   : > { %p16_p5 = scmp.ge.s32.totalorder %s19_s26, 4   ;;  %s5327_s22 = smov %s3058_s23 }
 0x250   : > { %s5328_s23 = smov %s3163_s10  ;;  %s5329_s24 = smov %s3066_s25 }
 0x251   : > { %s5330_s25 = smov %s5332_s29  ;;  %18 = sbr.rel (!%p16_p5) target bundleno = 4 (0x4), region = 83 }
 0x258   :  { %2706 = vsyncpa [#allocation4], 1 }
 0x259   :  { %2708 = vsyncpa [#allocation4 + $0x1], 1 }

</bundles_post_ra>
